<compile_context>
chip_gen: v7x
topology: tpu7x:2x2x1
jax: 0.10.0
libtpu: 0.0.40
codegen_flags: <defaults>
</compile_context>

<pallas_src>
import jax
import jax.numpy as jnp
from jax import lax
from jax.experimental import pallas as pl
from jax.experimental.pallas import tpu as pltpu

_CP = 128  # padded channel width (one lane tile) for all post-block-0 activations


def _round_up(n, m):
  return ((n + m - 1) // m) * m


# ---------------------------------------------------------------------------
# Fused kernel: the whole 4-block TCN in one grid step, all-VMEM resident.
# ---------------------------------------------------------------------------
def _make_fused_kernel(n_blocks, batch):
  """batch = padded batch (multiple of 8); rows are flattened t*batch + b."""

  def kernel(x_ref, w1b0_ref, w1s_ref, w2s_ref, bias_ref, o_ref):
    N = x_ref.shape[0]

    def delay(a, rows):
      # Causal delay by `rows` flattened rows (= d time steps; row = t*batch+b,
      # so the shift never bleeds across batch elements).  XLU sublane roll +
      # VALU row mask instead of a zero-concat, so no VMEM-copy traffic lands
      # on the critical path.
      if rows >= N:
        return jnp.zeros_like(a)
      rolled = pltpu.roll(a, shift=rows, axis=0)
      t = lax.broadcasted_iota(jnp.int32, a.shape, 0)
      return jnp.where(t < rows, 0.0, rolled)

    # TODO(synk): nn.Dropout(p=0.2) inside the TCN is treated as identity
    # (eval-mode semantics); train-mode randomness is not reproduced.
    h = x_ref[...]                        # (N, cin_p) f32, real channel width

    for i in range(n_blocks):             # static unroll; all indices static
      rows = (2 ** i) * batch
      dh = delay(h, rows)

      # conv1 (+ fused residual columns).  The residual branch (1x1 downsample
      # or identity) lives in output columns [_CP:2*_CP) of the conv1 weight,
      # so one matmul yields [z1_pre | res] and fills the 256-wide MXU output.
      if i == 0:
        # Block 0 contracts only over the real input channels, as two
        # small-depth dots (avoids a sub-128 lane concatenate).
        y = (jnp.dot(dh.astype(jnp.bfloat16), w1b0_ref[0],
                     preferred_element_type=jnp.float32)
             + jnp.dot(h.astype(jnp.bfloat16), w1b0_ref[1],
                       preferred_element_type=jnp.float32))
      else:
        # 256-deep fused two-tap contraction (native on v6e/v7x 256x256 MXU).
        # TODO(synk): on v5e (128-deep MXU) two separate 128-deep dots would
        # avoid materializing the (N, 256) concat for the same MXU pushes.
        cat = jnp.concatenate([dh, h], axis=-1).astype(jnp.bfloat16)
        y = jnp.dot(cat, w1s_ref[i - 1], preferred_element_type=jnp.float32)
      y = y + bias_ref[i, 0:1, :]         # [b1 | bd]  (f32)
      z = jnp.maximum(y[:, :_CP], 0.0)    # conv1 -> ReLU
      res = y[:, _CP:]                    # residual branch (downsample / id)

      # conv2 -> ReLU
      dz = delay(z, rows)
      cat2 = jnp.concatenate([dz, z], axis=-1).astype(jnp.bfloat16)
      z2 = (jnp.dot(cat2, w2s_ref[i], preferred_element_type=jnp.float32)
            + bias_ref[i, 1:2, :_CP])
      z2 = jnp.maximum(z2, 0.0)

      h = jnp.maximum(z2 + res, 0.0)      # ReLU(out + residual)

    o_ref[...] = h.astype(o_ref.dtype)    # lane-dense (N, _CP) store

  return kernel


def _fused_tcn(x2d, prepared, batch):
  """x2d: (N, cin_p) time-major flattened input -> (N, _CP) padded output."""
  N = x2d.shape[0]
  inputs = [x2d, prepared["w1_blk0"], prepared["w1s"],
            prepared["w2s"], prepared["bias"]]

  def full_spec(a):
    # Whole-array block (block dims equal array dims -> always legal).
    return pl.BlockSpec(a.shape, lambda i, _nd=a.ndim: (0,) * _nd)

  # All operands together are well under 1 MiB, so grid=(1,) with everything
  # VMEM-resident (default double-buffering included) is far from any scoped
  # VMEM limit on v5e/v6e/v7x.
  # TODO(synk): for large T*batch (esp. v7x: 64 MiB VMEM, 2 TensorCores),
  # switch to a time-chunked grid with a 2*(1+2+4+8)-step causal halo, a
  # leading "parallel" axis, single-buffered weight specs and an explicit
  # vmem_limit_bytes.
  return pl.pallas_call(
      _make_fused_kernel(prepared["n_blocks"], batch),
      out_shape=jax.ShapeDtypeStruct((N, _CP), jnp.float32),
      grid_spec=pltpu.PrefetchScalarGridSpec(
          num_scalar_prefetch=0,
          grid=(1,),
          in_specs=[full_spec(a) for a in inputs],
          out_specs=pl.BlockSpec((N, _CP), lambda i: (0, 0)),
      ),
      compiler_params=pltpu.CompilerParams(
          dimension_semantics=("arbitrary",)),
  )(*inputs)


# ---------------------------------------------------------------------------
# Parameters (deterministic synthetic init, mirroring TCN shapes).
# ---------------------------------------------------------------------------
def init_predictor_params(key, context_size, latent_size):
  channels = [context_size, context_size, context_size, latent_size]
  params = []
  cin = latent_size
  for cout in channels:
    key, *ks = jax.random.split(key, 9)
    blk = {
        # conv1: torch weight (cout, cin, 2) -> tap matrices (cin, cout);
        # tap 0 multiplies x[t-d], tap 1 multiplies x[t].
        "w1_0": 0.01 * jax.random.normal(ks[0], (cin, cout), jnp.float32),
        "w1_1": 0.01 * jax.random.normal(ks[1], (cin, cout), jnp.float32),
        "b1":   0.01 * jax.random.normal(ks[2], (1, cout), jnp.float32),
        # conv2: (cout, cout, 2)
        "w2_0": 0.01 * jax.random.normal(ks[3], (cout, cout), jnp.float32),
        "w2_1": 0.01 * jax.random.normal(ks[4], (cout, cout), jnp.float32),
        "b2":   0.01 * jax.random.normal(ks[5], (1, cout), jnp.float32),
    }
    if cin != cout:  # TemporalBlock.downsample = Conv1d(cin, cout, 1)
      blk["wd"] = 0.01 * jax.random.normal(ks[6], (cin, cout), jnp.float32)
      blk["bd"] = 0.01 * jax.random.normal(ks[7], (1, cout), jnp.float32)
    params.append(blk)
    cin = cout
  return params


def prepare_params(params):
  """Pack all weights into 4 stacked operands (bf16 MXU weights, f32 biases).

  Per block i (dilation 2**i):
    * conv1 weight: rows [0:_CP) multiply the d-delayed activation (tap 0),
      rows [_CP:2*_CP) the current one (tap 1); output columns [0:_CP) are the
      conv1 pre-activation, columns [_CP:2*_CP) the fused residual branch
      (1x1 downsample, or identity when cin == cout).
    * conv2 weight: same two-tap row stack, 128-wide output.
    * biases: row 0 = [b1 | bd], row 1 = [b2 | 0].
  Zero padding keeps unused lanes exactly zero through every block.
  TODO(synk): weight_norm is assumed pre-folded into dense conv weights.
  """
  n = len(params)
  cin0 = params[0]["w1_0"].shape[0]
  cin0_p = _round_up(cin0, 16)          # bf16 sublane tile = 16
  out_dim = params[-1]["w2_0"].shape[1]
  assert cin0 <= _CP and max(p["w1_0"].shape[1] for p in params) <= _CP, (
      "channel sizes > 128 would need a multi-tile channel layout")

  w1b0 = jnp.zeros((2, cin0_p, 2 * _CP), jnp.float32)
  w1s = jnp.zeros((n - 1, 2 * _CP, 2 * _CP), jnp.float32)
  w2s = jnp.zeros((n, 2 * _CP, _CP), jnp.float32)
  bias = jnp.zeros((n, 2, 2 * _CP), jnp.float32)

  for i, p in enumerate(params):
    ci, co = p["w1_0"].shape
    if i == 0:
      w1b0 = w1b0.at[0, :ci, :co].set(p["w1_0"])
      w1b0 = w1b0.at[1, :ci, :co].set(p["w1_1"])
      if "wd" in p:
        w1b0 = w1b0.at[1, :ci, _CP:_CP + co].set(p["wd"])
      else:
        w1b0 = w1b0.at[1, :ci, _CP:_CP + ci].set(jnp.eye(ci, dtype=jnp.float32))
    else:
      w1s = w1s.at[i - 1, :ci, :co].set(p["w1_0"])
      w1s = w1s.at[i - 1, _CP:_CP + ci, :co].set(p["w1_1"])
      if "wd" in p:
        w1s = w1s.at[i - 1, _CP:_CP + ci, _CP:_CP + co].set(p["wd"])
      else:
        w1s = w1s.at[i - 1, _CP:_CP + ci, _CP:_CP + ci].set(
            jnp.eye(ci, dtype=jnp.float32))
    w2s = w2s.at[i, :co, :co].set(p["w2_0"])
    w2s = w2s.at[i, _CP:_CP + co, :co].set(p["w2_1"])
    bias = bias.at[i, 0, :co].set(p["b1"][0])
    if "wd" in p:
      bias = bias.at[i, 0, _CP:_CP + co].set(p["bd"][0])
    bias = bias.at[i, 1, :co].set(p["b2"][0])

  return {
      "w1_blk0": w1b0.astype(jnp.bfloat16),
      "w1s": w1s.astype(jnp.bfloat16),
      "w2s": w2s.astype(jnp.bfloat16),
      "bias": bias,                      # f32
      "n_blocks": n,
      "cin_p": int(cin0_p),
      "out_dim": int(out_dim),
  }


# ---------------------------------------------------------------------------
# Predictor.forward
# ---------------------------------------------------------------------------
def predictor_forward(prepared, x, timestep=None):
  """x: (seq, batch, latent) -> (seq, batch, latent); None if timestep given."""
  if timestep is not None:
    return None  # matches the torch module (implicit None)
  T, B, C = x.shape
  Bp = _round_up(B, 8)                   # 8-aligned batch => aligned causal shifts
  Cp = prepared["cin_p"]
  if Bp != B or Cp != C:                 # no 128-lane input pad (kernel works at
    x = jnp.pad(x, ((0, 0), (0, Bp - B), (0, Cp - C)))   # real channel width)
  out_p = _fused_tcn(x.reshape(T * Bp, Cp), prepared, batch=Bp)
  return out_p.reshape(T, Bp, _CP)[:, :B, :prepared["out_dim"]]


# ---------------------------------------------------------------------------
# Pure-JAX f32 reference (correctness check for the Pallas path).
# ---------------------------------------------------------------------------
def _ref_forward(params, x):
  h = jnp.transpose(x, (1, 0, 2))
  for i, blk in enumerate(params):
    d = 2 ** i

    def shift(a):
      return jnp.pad(a, ((0, 0), (d, 0), (0, 0)))[:, : a.shape[1], :]

    y = shift(h) @ blk["w1_0"] + h @ blk["w1_1"] + blk["b1"]
    y = jnp.maximum(y, 0.0)
    y = shift(y) @ blk["w2_0"] + y @ blk["w2_1"] + blk["b2"]
    y = jnp.maximum(y, 0.0)
    res = (h @ blk["wd"] + blk["bd"]) if "wd" in blk else h
    h = jnp.maximum(y + res, 0.0)
  return jnp.transpose(h, (1, 0, 2))


if __name__ == "__main__":
  # Small shapes: seq=16, batch=4, latent=32, context=64 (the timesteps arg of
  # the torch module is unused in forward when timestep is None).
  SEQ, BATCH = 16, 4
  LATENT, CONTEXT = 32, 64

  key = jax.random.PRNGKey(0)
  k_param, k_x = jax.random.split(key)
  params = init_predictor_params(k_param, CONTEXT, LATENT)
  prepared = prepare_params(params)
  x = jax.random.normal(k_x, (SEQ, BATCH, LATENT), jnp.float32)

  out = predictor_forward(prepared, x, timestep=None)
  out = jax.block_until_ready(out)

  assert out.shape == (SEQ, BATCH, LATENT), out.shape
  ref = jax.block_until_ready(_ref_forward(params, x))
  # bf16 MXU operands (f32 accumulation) vs. the pure-f32 reference => relaxed
  # tolerance; observed error is well inside these bounds for 4 chained blocks.
  assert jnp.allclose(out, ref, rtol=2e-2, atol=2e-3), (
      float(jnp.max(jnp.abs(out - ref))))

  print("KERNEL_OK")
</pallas_src>

<mosaic_0001>
module attributes {stable_mosaic.version = 11 : i64} {
  func.func @kernel(%arg0: i32, %arg1: memref<128x32xf32, #tpu.memory_space<vmem>>, %arg2: memref<2x32x256xbf16, #tpu.memory_space<vmem>>, %arg3: memref<3x256x256xbf16, #tpu.memory_space<vmem>>, %arg4: memref<4x256x128xbf16, #tpu.memory_space<vmem>>, %arg5: memref<4x2x256xf32, #tpu.memory_space<vmem>>, %arg6: memref<128x128xf32, #tpu.memory_space<vmem>>) attributes {dimension_semantics = [#tpu.dimension_semantics<arbitrary>], iteration_bounds = array<i64: 1>, scalar_prefetch = 0 : i64, scratch_operands = 0 : i64, tpu.core_type = #tpu.core_type<tc>, window_params = [{pipeline_mode = #tpu.pipeline_mode<synchronous>, transform_indices = @transform_0, window_bounds = array<i64: 128, 32>}, {pipeline_mode = #tpu.pipeline_mode<synchronous>, transform_indices = @transform_1, window_bounds = array<i64: 2, 32, 256>}, {pipeline_mode = #tpu.pipeline_mode<synchronous>, transform_indices = @transform_2, window_bounds = array<i64: 3, 256, 256>}, {pipeline_mode = #tpu.pipeline_mode<synchronous>, transform_indices = @transform_3, window_bounds = array<i64: 4, 256, 128>}, {pipeline_mode = #tpu.pipeline_mode<synchronous>, transform_indices = @transform_4, window_bounds = array<i64: 4, 2, 256>}, {pipeline_mode = #tpu.pipeline_mode<synchronous>, transform_indices = @transform_5, window_bounds = array<i64: 128, 128>}]} {
    %c0 = arith.constant 0 : index
    %c0_0 = arith.constant 0 : index
    %0 = vector.load %arg1[%c0, %c0_0] : memref<128x32xf32, #tpu.memory_space<vmem>>, vector<128x32xf32>
    %c8_i32 = arith.constant 8 : i32
    %1 = tpu.dynamic_rotate %0 by %c8_i32 dim 0 : vector<128x32xf32>, i32 -> vector<128x32xf32>
    %2 = tpu.iota {dimensions = array<i32: 0>} : vector<128x32xi32>
    %c8_i32_1 = arith.constant 8 : i32
    %3 = vector.broadcast %c8_i32_1 : i32 to vector<128x32xi32>
    %4 = arith.cmpi slt, %2, %3 : vector<128x32xi32>
    %cst = arith.constant 0.000000e+00 : f32
    %5 = vector.broadcast %cst : f32 to vector<128x32xf32>
    %6 = arith.select %4, %5, %1 : vector<128x32xi1>, vector<128x32xf32>
    %7 = arith.truncf %6 : vector<128x32xf32> to vector<128x32xbf16>
    %c0_2 = arith.constant 0 : index
    %c0_3 = arith.constant 0 : index
    %c0_4 = arith.constant 0 : index
    %8 = vector.load %arg2[%c0_2, %c0_3, %c0_4] : memref<2x32x256xbf16, #tpu.memory_space<vmem>>, vector<1x32x256xbf16>
    %9 = vector.shape_cast %8 : vector<1x32x256xbf16> to vector<32x256xbf16>
    %cst_5 = arith.constant dense<0.000000e+00> : vector<128x256xf32>
    %10 = tpu.matmul %7, %9, %cst_5 {dimension_numbers = #tpu.dot_dimension_numbers<[1], [0], [0], [1], [0, 0, 1, 1], [], []>} : vector<128x32xbf16>, vector<32x256xbf16>, vector<128x256xf32> -> vector<128x256xf32>
    %11 = arith.truncf %0 : vector<128x32xf32> to vector<128x32xbf16>
    %c1 = arith.constant 1 : index
    %c0_6 = arith.constant 0 : index
    %c0_7 = arith.constant 0 : index
    %12 = vector.load %arg2[%c1, %c0_6, %c0_7] : memref<2x32x256xbf16, #tpu.memory_space<vmem>>, vector<1x32x256xbf16>
    %13 = vector.shape_cast %12 : vector<1x32x256xbf16> to vector<32x256xbf16>
    %cst_8 = arith.constant dense<0.000000e+00> : vector<128x256xf32>
    %14 = tpu.matmul %11, %13, %cst_8 {dimension_numbers = #tpu.dot_dimension_numbers<[1], [0], [0], [1], [0, 0, 1, 1], [], []>} : vector<128x32xbf16>, vector<32x256xbf16>, vector<128x256xf32> -> vector<128x256xf32>
    %15 = arith.addf %10, %14 : vector<128x256xf32>
    %c0_9 = arith.constant 0 : index
    %c0_10 = arith.constant 0 : index
    %c0_11 = arith.constant 0 : index
    %16 = vector.load %arg5[%c0_9, %c0_10, %c0_11] : memref<4x2x256xf32, #tpu.memory_space<vmem>>, vector<1x1x256xf32>
    %17 = vector.shape_cast %16 : vector<1x1x256xf32> to vector<1x256xf32>
    %18 = vector.broadcast %17 : vector<1x256xf32> to vector<128x256xf32>
    %19 = arith.addf %15, %18 : vector<128x256xf32>
    %20 = vector.extract_strided_slice %19 {offsets = [0, 0], sizes = [128, 128], strides = [1, 1]} : vector<128x256xf32> to vector<128x128xf32>
    %cst_12 = arith.constant 0.000000e+00 : f32
    %21 = vector.broadcast %cst_12 : f32 to vector<128x128xf32>
    %22 = arith.maximumf %20, %21 : vector<128x128xf32>
    %23 = vector.extract_strided_slice %19 {offsets = [0, 128], sizes = [128, 128], strides = [1, 1]} : vector<128x256xf32> to vector<128x128xf32>
    %c8_i32_13 = arith.constant 8 : i32
    %24 = tpu.dynamic_rotate %22 by %c8_i32_13 dim 0 : vector<128x128xf32>, i32 -> vector<128x128xf32>
    %25 = tpu.iota {dimensions = array<i32: 0>} : vector<128x128xi32>
    %c8_i32_14 = arith.constant 8 : i32
    %26 = vector.broadcast %c8_i32_14 : i32 to vector<128x128xi32>
    %27 = arith.cmpi slt, %25, %26 : vector<128x128xi32>
    %cst_15 = arith.constant 0.000000e+00 : f32
    %28 = vector.broadcast %cst_15 : f32 to vector<128x128xf32>
    %29 = arith.select %27, %28, %24 : vector<128x128xi1>, vector<128x128xf32>
    %30 = tpu.concatenate %29, %22 in 1 : vector<128x128xf32>, vector<128x128xf32> -> vector<128x256xf32>
    %31 = arith.truncf %30 : vector<128x256xf32> to vector<128x256xbf16>
    %c0_16 = arith.constant 0 : index
    %c0_17 = arith.constant 0 : index
    %c0_18 = arith.constant 0 : index
    %32 = vector.load %arg4[%c0_16, %c0_17, %c0_18] : memref<4x256x128xbf16, #tpu.memory_space<vmem>>, vector<1x256x128xbf16>
    %33 = vector.shape_cast %32 : vector<1x256x128xbf16> to vector<256x128xbf16>
    %cst_19 = arith.constant dense<0.000000e+00> : vector<128x128xf32>
    %34 = tpu.matmul %31, %33, %cst_19 {dimension_numbers = #tpu.dot_dimension_numbers<[1], [0], [0], [1], [0, 0, 1, 1], [], []>} : vector<128x256xbf16>, vector<256x128xbf16>, vector<128x128xf32> -> vector<128x128xf32>
    %c0_20 = arith.constant 0 : index
    %c1_21 = arith.constant 1 : index
    %c0_22 = arith.constant 0 : index
    %35 = vector.load %arg5[%c0_20, %c1_21, %c0_22] : memref<4x2x256xf32, #tpu.memory_space<vmem>>, vector<1x1x128xf32>
    %36 = vector.shape_cast %35 : vector<1x1x128xf32> to vector<1x128xf32>
    %37 = vector.broadcast %36 : vector<1x128xf32> to vector<128x128xf32>
    %38 = arith.addf %34, %37 : vector<128x128xf32>
    %cst_23 = arith.constant 0.000000e+00 : f32
    %39 = vector.broadcast %cst_23 : f32 to vector<128x128xf32>
    %40 = arith.maximumf %38, %39 : vector<128x128xf32>
    %41 = arith.addf %40, %23 : vector<128x128xf32>
    %cst_24 = arith.constant 0.000000e+00 : f32
    %42 = vector.broadcast %cst_24 : f32 to vector<128x128xf32>
    %43 = arith.maximumf %41, %42 : vector<128x128xf32>
    %c16_i32 = arith.constant 16 : i32
    %44 = tpu.dynamic_rotate %43 by %c16_i32 dim 0 : vector<128x128xf32>, i32 -> vector<128x128xf32>
    %45 = tpu.iota {dimensions = array<i32: 0>} : vector<128x128xi32>
    %c16_i32_25 = arith.constant 16 : i32
    %46 = vector.broadcast %c16_i32_25 : i32 to vector<128x128xi32>
    %47 = arith.cmpi slt, %45, %46 : vector<128x128xi32>
    %cst_26 = arith.constant 0.000000e+00 : f32
    %48 = vector.broadcast %cst_26 : f32 to vector<128x128xf32>
    %49 = arith.select %47, %48, %44 : vector<128x128xi1>, vector<128x128xf32>
    %50 = tpu.concatenate %49, %43 in 1 : vector<128x128xf32>, vector<128x128xf32> -> vector<128x256xf32>
    %51 = arith.truncf %50 : vector<128x256xf32> to vector<128x256xbf16>
    %c0_27 = arith.constant 0 : index
    %c0_28 = arith.constant 0 : index
    %c0_29 = arith.constant 0 : index
    %52 = vector.load %arg3[%c0_27, %c0_28, %c0_29] : memref<3x256x256xbf16, #tpu.memory_space<vmem>>, vector<1x256x256xbf16>
    %53 = vector.shape_cast %52 : vector<1x256x256xbf16> to vector<256x256xbf16>
    %cst_30 = arith.constant dense<0.000000e+00> : vector<128x256xf32>
    %54 = tpu.matmul %51, %53, %cst_30 {dimension_numbers = #tpu.dot_dimension_numbers<[1], [0], [0], [1], [0, 0, 1, 1], [], []>} : vector<128x256xbf16>, vector<256x256xbf16>, vector<128x256xf32> -> vector<128x256xf32>
    %c1_31 = arith.constant 1 : index
    %c0_32 = arith.constant 0 : index
    %c0_33 = arith.constant 0 : index
    %55 = vector.load %arg5[%c1_31, %c0_32, %c0_33] : memref<4x2x256xf32, #tpu.memory_space<vmem>>, vector<1x1x256xf32>
    %56 = vector.shape_cast %55 : vector<1x1x256xf32> to vector<1x256xf32>
    %57 = vector.broadcast %56 : vector<1x256xf32> to vector<128x256xf32>
    %58 = arith.addf %54, %57 : vector<128x256xf32>
    %59 = vector.extract_strided_slice %58 {offsets = [0, 0], sizes = [128, 128], strides = [1, 1]} : vector<128x256xf32> to vector<128x128xf32>
    %cst_34 = arith.constant 0.000000e+00 : f32
    %60 = vector.broadcast %cst_34 : f32 to vector<128x128xf32>
    %61 = arith.maximumf %59, %60 : vector<128x128xf32>
    %62 = vector.extract_strided_slice %58 {offsets = [0, 128], sizes = [128, 128], strides = [1, 1]} : vector<128x256xf32> to vector<128x128xf32>
    %c16_i32_35 = arith.constant 16 : i32
    %63 = tpu.dynamic_rotate %61 by %c16_i32_35 dim 0 : vector<128x128xf32>, i32 -> vector<128x128xf32>
    %64 = tpu.iota {dimensions = array<i32: 0>} : vector<128x128xi32>
    %c16_i32_36 = arith.constant 16 : i32
    %65 = vector.broadcast %c16_i32_36 : i32 to vector<128x128xi32>
    %66 = arith.cmpi slt, %64, %65 : vector<128x128xi32>
    %cst_37 = arith.constant 0.000000e+00 : f32
    %67 = vector.broadcast %cst_37 : f32 to vector<128x128xf32>
    %68 = arith.select %66, %67, %63 : vector<128x128xi1>, vector<128x128xf32>
    %69 = tpu.concatenate %68, %61 in 1 : vector<128x128xf32>, vector<128x128xf32> -> vector<128x256xf32>
    %70 = arith.truncf %69 : vector<128x256xf32> to vector<128x256xbf16>
    %c1_38 = arith.constant 1 : index
    %c0_39 = arith.constant 0 : index
    %c0_40 = arith.constant 0 : index
    %71 = vector.load %arg4[%c1_38, %c0_39, %c0_40] : memref<4x256x128xbf16, #tpu.memory_space<vmem>>, vector<1x256x128xbf16>
    %72 = vector.shape_cast %71 : vector<1x256x128xbf16> to vector<256x128xbf16>
    %cst_41 = arith.constant dense<0.000000e+00> : vector<128x128xf32>
    %73 = tpu.matmul %70, %72, %cst_41 {dimension_numbers = #tpu.dot_dimension_numbers<[1], [0], [0], [1], [0, 0, 1, 1], [], []>} : vector<128x256xbf16>, vector<256x128xbf16>, vector<128x128xf32> -> vector<128x128xf32>
    %c1_42 = arith.constant 1 : index
    %c1_43 = arith.constant 1 : index
    %c0_44 = arith.constant 0 : index
    %74 = vector.load %arg5[%c1_42, %c1_43, %c0_44] : memref<4x2x256xf32, #tpu.memory_space<vmem>>, vector<1x1x128xf32>
    %75 = vector.shape_cast %74 : vector<1x1x128xf32> to vector<1x128xf32>
    %76 = vector.broadcast %75 : vector<1x128xf32> to vector<128x128xf32>
    %77 = arith.addf %73, %76 : vector<128x128xf32>
    %cst_45 = arith.constant 0.000000e+00 : f32
    %78 = vector.broadcast %cst_45 : f32 to vector<128x128xf32>
    %79 = arith.maximumf %77, %78 : vector<128x128xf32>
    %80 = arith.addf %79, %62 : vector<128x128xf32>
    %cst_46 = arith.constant 0.000000e+00 : f32
    %81 = vector.broadcast %cst_46 : f32 to vector<128x128xf32>
    %82 = arith.maximumf %80, %81 : vector<128x128xf32>
    %c32_i32 = arith.constant 32 : i32
    %83 = tpu.dynamic_rotate %82 by %c32_i32 dim 0 : vector<128x128xf32>, i32 -> vector<128x128xf32>
    %84 = tpu.iota {dimensions = array<i32: 0>} : vector<128x128xi32>
    %c32_i32_47 = arith.constant 32 : i32
    %85 = vector.broadcast %c32_i32_47 : i32 to vector<128x128xi32>
    %86 = arith.cmpi slt, %84, %85 : vector<128x128xi32>
    %cst_48 = arith.constant 0.000000e+00 : f32
    %87 = vector.broadcast %cst_48 : f32 to vector<128x128xf32>
    %88 = arith.select %86, %87, %83 : vector<128x128xi1>, vector<128x128xf32>
    %89 = tpu.concatenate %88, %82 in 1 : vector<128x128xf32>, vector<128x128xf32> -> vector<128x256xf32>
    %90 = arith.truncf %89 : vector<128x256xf32> to vector<128x256xbf16>
    %c1_49 = arith.constant 1 : index
    %c0_50 = arith.constant 0 : index
    %c0_51 = arith.constant 0 : index
    %91 = vector.load %arg3[%c1_49, %c0_50, %c0_51] : memref<3x256x256xbf16, #tpu.memory_space<vmem>>, vector<1x256x256xbf16>
    %92 = vector.shape_cast %91 : vector<1x256x256xbf16> to vector<256x256xbf16>
    %cst_52 = arith.constant dense<0.000000e+00> : vector<128x256xf32>
    %93 = tpu.matmul %90, %92, %cst_52 {dimension_numbers = #tpu.dot_dimension_numbers<[1], [0], [0], [1], [0, 0, 1, 1], [], []>} : vector<128x256xbf16>, vector<256x256xbf16>, vector<128x256xf32> -> vector<128x256xf32>
    %c2 = arith.constant 2 : index
    %c0_53 = arith.constant 0 : index
    %c0_54 = arith.constant 0 : index
    %94 = vector.load %arg5[%c2, %c0_53, %c0_54] : memref<4x2x256xf32, #tpu.memory_space<vmem>>, vector<1x1x256xf32>
    %95 = vector.shape_cast %94 : vector<1x1x256xf32> to vector<1x256xf32>
    %96 = vector.broadcast %95 : vector<1x256xf32> to vector<128x256xf32>
    %97 = arith.addf %93, %96 : vector<128x256xf32>
    %98 = vector.extract_strided_slice %97 {offsets = [0, 0], sizes = [128, 128], strides = [1, 1]} : vector<128x256xf32> to vector<128x128xf32>
    %cst_55 = arith.constant 0.000000e+00 : f32
    %99 = vector.broadcast %cst_55 : f32 to vector<128x128xf32>
    %100 = arith.maximumf %98, %99 : vector<128x128xf32>
    %101 = vector.extract_strided_slice %97 {offsets = [0, 128], sizes = [128, 128], strides = [1, 1]} : vector<128x256xf32> to vector<128x128xf32>
    %c32_i32_56 = arith.constant 32 : i32
    %102 = tpu.dynamic_rotate %100 by %c32_i32_56 dim 0 : vector<128x128xf32>, i32 -> vector<128x128xf32>
    %103 = tpu.iota {dimensions = array<i32: 0>} : vector<128x128xi32>
    %c32_i32_57 = arith.constant 32 : i32
    %104 = vector.broadcast %c32_i32_57 : i32 to vector<128x128xi32>
    %105 = arith.cmpi slt, %103, %104 : vector<128x128xi32>
    %cst_58 = arith.constant 0.000000e+00 : f32
    %106 = vector.broadcast %cst_58 : f32 to vector<128x128xf32>
    %107 = arith.select %105, %106, %102 : vector<128x128xi1>, vector<128x128xf32>
    %108 = tpu.concatenate %107, %100 in 1 : vector<128x128xf32>, vector<128x128xf32> -> vector<128x256xf32>
    %109 = arith.truncf %108 : vector<128x256xf32> to vector<128x256xbf16>
    %c2_59 = arith.constant 2 : index
    %c0_60 = arith.constant 0 : index
    %c0_61 = arith.constant 0 : index
    %110 = vector.load %arg4[%c2_59, %c0_60, %c0_61] : memref<4x256x128xbf16, #tpu.memory_space<vmem>>, vector<1x256x128xbf16>
    %111 = vector.shape_cast %110 : vector<1x256x128xbf16> to vector<256x128xbf16>
    %cst_62 = arith.constant dense<0.000000e+00> : vector<128x128xf32>
    %112 = tpu.matmul %109, %111, %cst_62 {dimension_numbers = #tpu.dot_dimension_numbers<[1], [0], [0], [1], [0, 0, 1, 1], [], []>} : vector<128x256xbf16>, vector<256x128xbf16>, vector<128x128xf32> -> vector<128x128xf32>
    %c2_63 = arith.constant 2 : index
    %c1_64 = arith.constant 1 : index
    %c0_65 = arith.constant 0 : index
    %113 = vector.load %arg5[%c2_63, %c1_64, %c0_65] : memref<4x2x256xf32, #tpu.memory_space<vmem>>, vector<1x1x128xf32>
    %114 = vector.shape_cast %113 : vector<1x1x128xf32> to vector<1x128xf32>
    %115 = vector.broadcast %114 : vector<1x128xf32> to vector<128x128xf32>
    %116 = arith.addf %112, %115 : vector<128x128xf32>
    %cst_66 = arith.constant 0.000000e+00 : f32
    %117 = vector.broadcast %cst_66 : f32 to vector<128x128xf32>
    %118 = arith.maximumf %116, %117 : vector<128x128xf32>
    %119 = arith.addf %118, %101 : vector<128x128xf32>
    %cst_67 = arith.constant 0.000000e+00 : f32
    %120 = vector.broadcast %cst_67 : f32 to vector<128x128xf32>
    %121 = arith.maximumf %119, %120 : vector<128x128xf32>
    %c64_i32 = arith.constant 64 : i32
    %122 = tpu.dynamic_rotate %121 by %c64_i32 dim 0 : vector<128x128xf32>, i32 -> vector<128x128xf32>
    %123 = tpu.iota {dimensions = array<i32: 0>} : vector<128x128xi32>
    %c64_i32_68 = arith.constant 64 : i32
    %124 = vector.broadcast %c64_i32_68 : i32 to vector<128x128xi32>
    %125 = arith.cmpi slt, %123, %124 : vector<128x128xi32>
    %cst_69 = arith.constant 0.000000e+00 : f32
    %126 = vector.broadcast %cst_69 : f32 to vector<128x128xf32>
    %127 = arith.select %125, %126, %122 : vector<128x128xi1>, vector<128x128xf32>
    %128 = tpu.concatenate %127, %121 in 1 : vector<128x128xf32>, vector<128x128xf32> -> vector<128x256xf32>
    %129 = arith.truncf %128 : vector<128x256xf32> to vector<128x256xbf16>
    %c2_70 = arith.constant 2 : index
    %c0_71 = arith.constant 0 : index
    %c0_72 = arith.constant 0 : index
    %130 = vector.load %arg3[%c2_70, %c0_71, %c0_72] : memref<3x256x256xbf16, #tpu.memory_space<vmem>>, vector<1x256x256xbf16>
    %131 = vector.shape_cast %130 : vector<1x256x256xbf16> to vector<256x256xbf16>
    %cst_73 = arith.constant dense<0.000000e+00> : vector<128x256xf32>
    %132 = tpu.matmul %129, %131, %cst_73 {dimension_numbers = #tpu.dot_dimension_numbers<[1], [0], [0], [1], [0, 0, 1, 1], [], []>} : vector<128x256xbf16>, vector<256x256xbf16>, vector<128x256xf32> -> vector<128x256xf32>
    %c3 = arith.constant 3 : index
    %c0_74 = arith.constant 0 : index
    %c0_75 = arith.constant 0 : index
    %133 = vector.load %arg5[%c3, %c0_74, %c0_75] : memref<4x2x256xf32, #tpu.memory_space<vmem>>, vector<1x1x256xf32>
    %134 = vector.shape_cast %133 : vector<1x1x256xf32> to vector<1x256xf32>
    %135 = vector.broadcast %134 : vector<1x256xf32> to vector<128x256xf32>
    %136 = arith.addf %132, %135 : vector<128x256xf32>
    %137 = vector.extract_strided_slice %136 {offsets = [0, 0], sizes = [128, 128], strides = [1, 1]} : vector<128x256xf32> to vector<128x128xf32>
    %cst_76 = arith.constant 0.000000e+00 : f32
    %138 = vector.broadcast %cst_76 : f32 to vector<128x128xf32>
    %139 = arith.maximumf %137, %138 : vector<128x128xf32>
    %140 = vector.extract_strided_slice %136 {offsets = [0, 128], sizes = [128, 128], strides = [1, 1]} : vector<128x256xf32> to vector<128x128xf32>
    %c64_i32_77 = arith.constant 64 : i32
    %141 = tpu.dynamic_rotate %139 by %c64_i32_77 dim 0 : vector<128x128xf32>, i32 -> vector<128x128xf32>
    %142 = tpu.iota {dimensions = array<i32: 0>} : vector<128x128xi32>
    %c64_i32_78 = arith.constant 64 : i32
    %143 = vector.broadcast %c64_i32_78 : i32 to vector<128x128xi32>
    %144 = arith.cmpi slt, %142, %143 : vector<128x128xi32>
    %cst_79 = arith.constant 0.000000e+00 : f32
    %145 = vector.broadcast %cst_79 : f32 to vector<128x128xf32>
    %146 = arith.select %144, %145, %141 : vector<128x128xi1>, vector<128x128xf32>
    %147 = tpu.concatenate %146, %139 in 1 : vector<128x128xf32>, vector<128x128xf32> -> vector<128x256xf32>
    %148 = arith.truncf %147 : vector<128x256xf32> to vector<128x256xbf16>
    %c3_80 = arith.constant 3 : index
    %c0_81 = arith.constant 0 : index
    %c0_82 = arith.constant 0 : index
    %149 = vector.load %arg4[%c3_80, %c0_81, %c0_82] : memref<4x256x128xbf16, #tpu.memory_space<vmem>>, vector<1x256x128xbf16>
    %150 = vector.shape_cast %149 : vector<1x256x128xbf16> to vector<256x128xbf16>
    %cst_83 = arith.constant dense<0.000000e+00> : vector<128x128xf32>
    %151 = tpu.matmul %148, %150, %cst_83 {dimension_numbers = #tpu.dot_dimension_numbers<[1], [0], [0], [1], [0, 0, 1, 1], [], []>} : vector<128x256xbf16>, vector<256x128xbf16>, vector<128x128xf32> -> vector<128x128xf32>
    %c3_84 = arith.constant 3 : index
    %c1_85 = arith.constant 1 : index
    %c0_86 = arith.constant 0 : index
    %152 = vector.load %arg5[%c3_84, %c1_85, %c0_86] : memref<4x2x256xf32, #tpu.memory_space<vmem>>, vector<1x1x128xf32>
    %153 = vector.shape_cast %152 : vector<1x1x128xf32> to vector<1x128xf32>
    %154 = vector.broadcast %153 : vector<1x128xf32> to vector<128x128xf32>
    %155 = arith.addf %151, %154 : vector<128x128xf32>
    %cst_87 = arith.constant 0.000000e+00 : f32
    %156 = vector.broadcast %cst_87 : f32 to vector<128x128xf32>
    %157 = arith.maximumf %155, %156 : vector<128x128xf32>
    %158 = arith.addf %157, %140 : vector<128x128xf32>
    %cst_88 = arith.constant 0.000000e+00 : f32
    %159 = vector.broadcast %cst_88 : f32 to vector<128x128xf32>
    %160 = arith.maximumf %158, %159 : vector<128x128xf32>
    %c0_89 = arith.constant 0 : index
    %c0_90 = arith.constant 0 : index
    %161 = vector.load %arg6[%c0_89, %c0_90] : memref<128x128xf32, #tpu.memory_space<vmem>>, vector<128x128xf32>
    tpu.vector_store %arg6[%c0_89, %c0_90], %160 {strides = array<i32>} : memref<128x128xf32, #tpu.memory_space<vmem>>, vector<128x128xf32>,
    return
  }
  func.func @transform_0(%arg0: i32) -> (i32, i32) {
    %c0_i32 = arith.constant 0 : i32
    %c0_i32_0 = arith.constant 0 : i32
    %c0_i32_1 = arith.constant 0 : i32
    return %c0_i32, %c0_i32_0 : i32, i32
  }
  func.func @transform_1(%arg0: i32) -> (i32, i32, i32) {
    %c0_i32 = arith.constant 0 : i32
    %c0_i32_0 = arith.constant 0 : i32
    %c0_i32_1 = arith.constant 0 : i32
    %c0_i32_2 = arith.constant 0 : i32
    return %c0_i32, %c0_i32_0, %c0_i32_1 : i32, i32, i32
  }
  func.func @transform_2(%arg0: i32) -> (i32, i32, i32) {
    %c0_i32 = arith.constant 0 : i32
    %c0_i32_0 = arith.constant 0 : i32
    %c0_i32_1 = arith.constant 0 : i32
    %c0_i32_2 = arith.constant 0 : i32
    return %c0_i32, %c0_i32_0, %c0_i32_1 : i32, i32, i32
  }
  func.func @transform_3(%arg0: i32) -> (i32, i32, i32) {
    %c0_i32 = arith.constant 0 : i32
    %c0_i32_0 = arith.constant 0 : i32
    %c0_i32_1 = arith.constant 0 : i32
    %c0_i32_2 = arith.constant 0 : i32
    return %c0_i32, %c0_i32_0, %c0_i32_1 : i32, i32, i32
  }
  func.func @transform_4(%arg0: i32) -> (i32, i32, i32) {
    %c0_i32 = arith.constant 0 : i32
    %c0_i32_0 = arith.constant 0 : i32
    %c0_i32_1 = arith.constant 0 : i32
    %c0_i32_2 = arith.constant 0 : i32
    return %c0_i32, %c0_i32_0, %c0_i32_1 : i32, i32, i32
  }
  func.func @transform_5(%arg0: i32) -> (i32, i32) {
    %c0_i32 = arith.constant 0 : i32
    %c0_i32_0 = arith.constant 0 : i32
    %c0_i32_1 = arith.constant 0 : i32
    return %c0_i32, %c0_i32_0 : i32, i32
  }
}

</mosaic_0001>

<bundles_post_ra>
// kernel: tpu_custom_call.1
= control target key start
LH: loop header
LB: loop body
LE: loop exit
PB: predicated region body
PF: predicated region fallthrough
CT: control target
= control target key end

     0   :  { %10 = vsyncpa [#allocation3], 0  ;;  %s4486_s0 = inlined_call_operand.vmem [shape: f32[128,32], index: 0, kind: input, shape index: {}]   ;;  %s4487_s1 = inlined_call_operand.vmem [shape: bf16[2,32,256], index: 1, kind: input, shape index: {}]   ;;  %s4488_s2 = inlined_call_operand.hbm [shape: bf16[3,256,256], index: 2, kind: input, shape index: {}]   ;;  %s4489_s3 = inlined_call_operand.hbm [shape: bf16[4,256,128], index: 3, kind: input, shape index: {}]   ;;  %s4490_s4 = inlined_call_operand.vmem [shape: f32[4,2,256], index: 4, kind: input, shape index: {}]   ;;  %s4491_s5 = inlined_call_operand.hbm [shape: f32[128,128], index: 5, kind: output, shape index: {}]  }
   0x1   :  { %11 = vsyncpa [#allocation6], 0 }
   0x2   :  { %12 = vsyncpa [#allocation4], 0  ;;  %s3732_s18 = smov [#allocation2]   ;;  %s3660_s22 = scalar_lea.hbm %s4488_s2, 12288 }
   0x3   :  { %s22_s19 = sshll.u32 %s3732_s18, 4  ;;  %p3661_p0 = scmp.ne.s32.totalorder %s4488_s2, %s3660_s22  ;;  %s23_s19 = int_to_ptr.vmem [resolvable:$true] %s22_s19 }
   0x4   :  { %p3664_p1 = scmp.lt.u32.totalorder %s3660_s22, %s4488_s2 }
   0x6   :  { %p3666_p2 = pnand %p3664_p1, %p3661_p0 }
   0x8   :  { %3669 = shalt.err (!%p3666_p2)
}
   0x9   :  { %s3670_s27 = scalar_lea.vmem %s23_s19, 12288  ;;  %p3675_p4 = scmp.lt.s32.totalorder %s23_s19, %s23_s19 }
   0xa   :  { %p3671_p3 = scmp.ne.s32.totalorder %s23_s19, %s3670_s27  ;;  %p3676_p5 = scmp.lt.s32.totalorder %s3670_s27, %s3670_s27 }
   0xc   :  { %p3677_p6 = por %p3676_p5, %p3675_p4 }
   0xe   :  { %p3678_p7 = pnand %p3677_p6, %p3671_p3 }
  0x10   :  { %3681 = shalt.err (!%p3678_p7)
}
  0x11   :  { %s3733_s28 = smov 128   ;;  %s3734_s29 = smov 8  }
  0x12   :  { %28 = dma.hbm_to_vmem [thread:$0]  %s4488_s2, 12288, %s23_s19, [#allocation3], %s3733_s28, %s3733_s28, %s3734_s29  }
  0x13   :  { %s3735_s7 = smov [#allocation5]   ;;  %s3682_s11 = scalar_lea.hbm %s4489_s3, 8192 }
  0x14   :  { %s34_s8 = sshll.u32 %s3735_s7, 4  ;;  %p3683_p8 = scmp.ne.s32.totalorder %s4489_s3, %s3682_s11  ;;  %s35_s8 = int_to_ptr.vmem [resolvable:$true] %s34_s8 }
  0x15   :  { %p3686_p9 = scmp.lt.u32.totalorder %s3682_s11, %s4489_s3 }
  0x17   :  { %p3688_p10 = pnand %p3686_p9, %p3683_p8 }
  0x19   :  { %3691 = shalt.err (!%p3688_p10)
}
  0x1a   :  { %s3692_s16 = scalar_lea.vmem %s35_s8, 8192  ;;  %p3697_p12 = scmp.lt.s32.totalorder %s35_s8, %s35_s8 }
  0x1b   :  { %p3693_p11 = scmp.ne.s32.totalorder %s35_s8, %s3692_s16  ;;  %p3698_p13 = scmp.lt.s32.totalorder %s3692_s16, %s3692_s16 }
  0x1d   :  { %p3699_p0 = por %p3698_p13, %p3697_p12 }
  0x1f   :  { %p3700_p1 = pnand %p3699_p0, %p3693_p11 }
  0x21   :  { %3703 = shalt.err (!%p3700_p1)
}
  0x22   :  { %s3736_s2 = smov 64   ;;  %s3737_s17 = smov 4  }
  0x23   :  { %40 = dma.hbm_to_vmem [thread:$0]  %s4489_s3, 8192, %s35_s8, [#allocation6], %s3736_s2, %s3736_s2, %s3737_s17  }
  0x24   :  { %3726 = dma.done.wait [#allocation3], 12288  }
  0x25   :  { %3727 = vsyncadd [#allocation3], 4294955008 }
  0x26   :  { %3728 = dma.done.wait [#allocation6], 8192  }
  0x27   :  { %3729 = vsyncadd [#allocation6], 4294959104  ;;  %v3738_v0 = vmov 0   ;;  %v3440_v1 = vld [vmem:[%s4487_s1 + $0x24] ss:$8 sps:$4 sm:$0xff]   ;;  %vm160_vm0 = vcmask 261120  }
  0x28   :  { %217 = vmatprep.mubr.bf16.mxu0 %v3738_v0  ;;  %257 = vmatprep.mubr.bf16.mxu1 %v3738_v0  ;;  %v3442_v2 = vld [vmem:[%s4487_s1 + $0x20] ss:$8 sps:$4 sm:$0xff]   ;;  %v3443_v3 = vld [vmem:[%s4487_s1 + $0x34] ss:$8 sps:$4 sm:$0xff]   ;;  %v3445_v4 = vld [vmem:[%s4487_s1 + $0x30] ss:$8 sps:$4 sm:$0xff]  }
  0x29   :  { %185 = vmatprep.subr.bf16.mxu0 %v3440_v1  ;;  %v3816_v5 = vld [vmem:[%s4486_s0] sm:$0xff]  ;;  %3394 = vmatprep.subr.bf16.mxu1 %v3440_v1  ;;  %v3821_v6 = vld [vmem:[%s4486_s0 + $0x8] sm:$0xff]  ;;  %v3451_v10 = vld [vmem:[%s4487_s1 + $0x14] ss:$8 sps:$4 sm:$0xff]   ;;  %v3739_v45 = vmov 0.0  }
  0x2a   :  { %186 = vmatpush1.bf16.msra.mxu0 %v3442_v2  ;;  %3396 = vmatpush1.bf16.msra.mxu1 %v3442_v2  ;;  %v3448_v7 = vld [vmem:[%s4487_s1 + $0x4] ss:$8 sps:$4 sm:$0xff]   ;;  %v127_v8 = vpack.c.bf16 %v3821_v6, %v3816_v5  ;;  %v3446_v9 = vld [vmem:[%s4487_s1] ss:$8 sps:$4 sm:$0xff]   ;;  %v3847_v13 = vld [vmem:[%s4486_s0 + $0x10] sm:$0xff]  ;;  %v115_v46 = vpack.c.bf16 %v3816_v5, %v3739_v45 }
  0x2b   :  { %187 = vmatprep.subr.bf16.mxu0 %v3443_v3  ;;  %3395 = vmatprep.subr.bf16.mxu1 %v3443_v3  ;;  %v3837_v11 = vld [vmem:[%s4486_s0 + $0x40] sm:$0xff]  ;;  %v3842_v12 = vld [vmem:[%s4486_s0 + $0x48] sm:$0xff]  ;;  %v3855_v15 = vld [vmem:[%s4486_s0 + $0x18] sm:$0xff]  ;;  %v116_v47 = vpack.c.bf16 %v3847_v13, %v3821_v6  ;;  %v457_v3 = vlaneseq }
  0x2c   :  { %v131_v14 = vpack.c.bf16 %v3842_v12, %v3837_v11  ;;  %v3449_v16 = vld [vmem:[%s4487_s1 + $0x10] ss:$8 sps:$4 sm:$0xff]   ;;  %v3452_v19 = vld [vmem:[#allocation5 + $0x40] sm:$0xff]   ;;  %v3454_v21 = vld [vmem:[#allocation5 + $0x48] sm:$0xff]   ;;  %v128_v22 = vpack.c.bf16 %v3855_v15, %v3847_v13 }
  0x2d   :  { %v3864_v17 = vld [vmem:[%s4486_s0 + $0x50] sm:$0xff]  ;;  %v3869_v18 = vld [vmem:[%s4486_s0 + $0x58] sm:$0xff]  ;;  %v3453_v20 = vld [vmem:[#allocation5] sm:$0xff]  }
  0x2e   :  { %188 = vmatpush1.bf16.msra.mxu0 %v3445_v4  ;;  %3397 = vmatpush1.bf16.msra.mxu1 %v3445_v4  ;;  %v3455_v23 = vld [vmem:[#allocation5 + $0x8] sm:$0xff]   ;;  %v3456_v24 = vld [vmem:[#allocation5 + $0x50] sm:$0xff]   ;;  %v132_v25 = vpack.c.bf16 %v3869_v18, %v3864_v17  ;;  %v54_v26 = vld [vmem:[%s4486_s0 + $0x20] sm:$0xff]  ;;  %v120_v51 = vpack.c.bf16 %v3864_v17, %v3842_v12 }
  0x2f   :  { %342 = vmatprep.subr.bf16.mxu0 %v3448_v7  ;;  %3138 = vmatprep.subr.bf16.mxu1 %v3452_v19  ;;  %v55_v27 = vld [vmem:[%s4486_s0 + $0x28] sm:$0xff]  ;;  %v3457_v28 = vld [vmem:[#allocation5 + $0x10] sm:$0xff]   ;;  %v62_v29 = vld [vmem:[%s4486_s0 + $0x60] sm:$0xff]  ;;  %v117_v48 = vpack.c.bf16 %v54_v26, %v3855_v15  ;;  %v458_v7 = vshrl.u32 %v457_v3, 7 }
  0x30   :  { %v3458_v30 = vld [vmem:[#allocation5 + $0x58] sm:$0xff]   ;;  %v63_v31 = vld [vmem:[%s4486_s0 + $0x68] sm:$0xff]  ;;  %v129_v33 = vpack.c.bf16 %v55_v27, %v54_v26  ;;  %v3460_v34 = vld [vmem:[#allocation5 + $0x60] sm:$0xff]   ;;  %v121_v52 = vpack.c.bf16 %v62_v29, %v3869_v18 }
  0x31   :  { %2948 = vmatmul.mubr.msk.bf16.vlgmr.msra.gmra.mrb[0].mxu0 %vm160_vm0, %v127_v8  ;;  %2952 = vmatmul.mubr.msk.bf16.vlgmr.msra.gmra.mrb[0].mxu1 %vm160_vm0, %v131_v14  ;;  %v3459_v32 = vld [vmem:[#allocation5 + $0x18] sm:$0xff]   ;;  %v133_v35 = vpack.c.bf16 %v63_v31, %v62_v29  ;;  %v3461_v36 = vld [vmem:[#allocation5 + $0x20] sm:$0xff]   ;;  %v56_v37 = vld [vmem:[%s4486_s0 + $0x30] sm:$0xff] }
  0x32   :  { %343 = vmatpush1.bf16.msra.mxu0 %v3446_v9  ;;  %227 = vmatprep.mubr.bf16.mxu0 %v3738_v0  ;;  %v57_v38 = vld [vmem:[%s4486_s0 + $0x38] sm:$0xff]  ;;  %v3462_v39 = vld [vmem:[#allocation5 + $0x68] sm:$0xff]   ;;  %v64_v40 = vld [vmem:[%s4486_s0 + $0x70] sm:$0xff]  ;;  %v118_v49 = vpack.c.bf16 %v56_v37, %v55_v27  ;;  %v3960_v9 = vsub.s32 0, %v458_v7 }
  0x33   :  { %344 = vmatprep.subr.bf16.mxu0 %v3451_v10  ;;  %267 = vmatprep.mubr.bf16.mxu1 %v3738_v0  ;;  %v65_v41 = vld [vmem:[%s4486_s0 + $0x78] sm:$0xff]  ;;  %v3463_v42 = vld [vmem:[#allocation5 + $0x28] sm:$0xff]   ;;  %v130_v43 = vpack.c.bf16 %v57_v38, %v56_v37  ;;  %v119_v50 = vpack.c.bf16 %v3837_v11, %v57_v38  ;;  %v122_v53 = vpack.c.bf16 %v64_v40, %v63_v31  ;;  %v3464_v54 = vld [vmem:[#allocation5 + $0x70] sm:$0xff]   ;;  %v3965_v11 = vsub.s32 1, %v458_v7 }
  0x34   :  { %3139 = vmatpush3.bf16.msra.mxu1 %v3453_v20  ;;  %v134_v44 = vpack.c.bf16 %v65_v41, %v64_v40  ;;  %v3465_v55 = vld [vmem:[#allocation5 + $0x30] sm:$0xff]   ;;  %v3466_v56 = vld [vmem:[#allocation5 + $0x78] sm:$0xff]   ;;  %v3470_v58 = vld [vmem:[#allocation2 + $0x4] ss:$8 sps:$4 sm:$0xff]  }
  0x35   :  { %3140 = vmatprep.subr.bf16.mxu1 %v3454_v21  ;;  %v3467_v57 = vld [vmem:[#allocation5 + $0x38] sm:$0xff]   ;;  %v455_v10 = vld [vmem:[%s4490_s4] ss:$2 sm:$0x3] }
  0x36   :  { %345 = vmatpush1.bf16.msra.mxu0 %v3449_v16  ;;  %v3974_v15 = vrot.slane %v455_v10, %v3960_v9  ;;  %v3979_v17 = vrot.slane %v455_v10, %v3965_v11  ;;  %v3468_v29 = vld [vmem:[#allocation2] ss:$8 sps:$4 sm:$0xff]   ;;  %v3471_v40 = vld [vmem:[#allocation2 + $0x10] ss:$8 sps:$4 sm:$0xff]  }
  0x38   :  { %3141 = vmatpush3.bf16.msra.mxu1 %v3455_v23 }
  0x39   :  { %2949 = vmatmul.mubr.msk.bf16.gmra.mrb[4].mxu0 %vm160_vm0, %v128_v22  ;;  %3142 = vmatprep.subr.bf16.mxu1 %v3456_v24 }
  0x3a   :  { %237 = vmatprep.mubr.bf16.mxu0 %v3738_v0  ;;  %2953 = vmatmul.mubr.msk.bf16.gmra.mrb[4].mxu1 %vm160_vm0, %v132_v25 }
  0x3b   :  { %277 = vmatprep.mubr.bf16.mxu1 %v3738_v0 }
  0x3c   :  { %3143 = vmatpush3.bf16.msra.mxu1 %v3457_v28 }
  0x3d   :  { %3144 = vmatprep.subr.bf16.mxu1 %v3458_v30 }
  0x40   :  { %3145 = vmatpush3.bf16.msra.mxu1 %v3459_v32  ;;  %v3473_v32 = vld [vmem:[#allocation2 + $0x14] ss:$8 sps:$4 sm:$0xff]  }
  0x41   :  { %2950 = vmatmul.mubr.msk.bf16.gmra.mrb[8].mxu0 %vm160_vm0, %v129_v33  ;;  %3146 = vmatprep.subr.bf16.mxu1 %v3460_v34 }
  0x42   :  { %247 = vmatprep.mubr.bf16.mxu0 %v3738_v0  ;;  %2954 = vmatmul.mubr.msk.bf16.gmra.mrb[8].mxu1 %vm160_vm0, %v133_v35 }
  0x43   :  { %287 = vmatprep.mubr.bf16.mxu1 %v3738_v0 }
  0x44   :  { %3147 = vmatpush3.bf16.msra.mxu1 %v3461_v36 }
  0x45   :  { %3148 = vmatprep.subr.bf16.mxu1 %v3462_v39 }
  0x48   :  { %3149 = vmatpush3.bf16.msra.mxu1 %v3463_v42  ;;  %v3476_v42 = vld [vmem:[#allocation2 + $0x24] ss:$8 sps:$4 sm:$0xff]  }
  0x49   :  { %2951 = vmatmul.mubr.msk.bf16.gmra.mrb[12].mxu0 %vm160_vm0, %v130_v43  ;;  %3150 = vmatprep.subr.bf16.mxu1 %v3464_v54 }
  0x4a   :  { %374 = vmatprep.mubr.bf16.mxu0 %v3738_v0  ;;  %2955 = vmatmul.mubr.msk.bf16.gmra.mrb[12].mxu1 %vm160_vm0, %v134_v44 }
  0x4c   :  { %3151 = vmatpush3.bf16.msra.mxu1 %v3465_v55 }
  0x4d   :  { %3152 = vmatprep.subr.bf16.mxu1 %v3466_v56  ;;  %v3477_v56 = vld [vmem:[#allocation2 + $0x30] ss:$8 sps:$4 sm:$0xff]  }
  0x50   :  { %3153 = vmatpush3.bf16.msra.mxu1 %v3467_v57 }
  0x51   :  { %2960 = vmatmul.mubr.msk.bf16.vlgmr.msra.gmra.mrb[0].mxu0 %vm160_vm0, %v115_v46  ;;  %1078 = vmatprep.subr.bf16.mxu1 %v3470_v58  ;;  %v3474_v46 = vld [vmem:[#allocation2 + $0x20] ss:$8 sps:$4 sm:$0xff]   ;;  %v3482_v58 = vld [vmem:[#allocation2 + $0x44] ss:$8 sps:$4 sm:$0xff]  }
  0x52   :  { %384 = vmatprep.mubr.bf16.mxu0 %v3738_v0 }
  0x59   :  { %2961 = vmatmul.mubr.msk.bf16.gmra.mrb[4].mxu0 %vm160_vm0, %v116_v47 }
  0x5a   :  { %394 = vmatprep.mubr.bf16.mxu0 %v3738_v0 }
  0x61   :  { %2962 = vmatmul.mubr.msk.bf16.gmra.mrb[8].mxu0 %vm160_vm0, %v117_v48  ;;  %v3479_v48 = vld [vmem:[#allocation2 + $0x34] ss:$8 sps:$4 sm:$0xff]  }
  0x62   :  { %404 = vmatprep.mubr.bf16.mxu0 %v3738_v0 }
  0x69   :  { %2963 = vmatmul.mubr.msk.bf16.gmra.mrb[12].mxu0 %vm160_vm0, %v118_v49 }
  0x6a   :  { %414 = vmatprep.mubr.bf16.mxu0 %v3738_v0 }
  0x71   :  { %2964 = vmatmul.mubr.msk.bf16.gmra.mrb[16].mxu0 %vm160_vm0, %v119_v50 }
  0x72   :  { %424 = vmatprep.mubr.bf16.mxu0 %v3738_v0 }
  0x79   :  { %2965 = vmatmul.mubr.msk.bf16.gmra.mrb[20].mxu0 %vm160_vm0, %v120_v51 }
  0x7a   :  { %434 = vmatprep.mubr.bf16.mxu0 %v3738_v0 }
  0x81   :  { %2966 = vmatmul.mubr.msk.bf16.gmra.mrb[24].mxu0 %vm160_vm0, %v121_v52 }
  0x82   :  { %444 = vmatprep.mubr.bf16.mxu0 %v3738_v0 }
  0x89   :  { %2967 = vmatmul.mubr.msk.bf16.gmra.mrb[28].mxu0 %vm160_vm0, %v122_v53 }
 0x104   :  { %v3936_v59 = vpop.f32.mrb[0].mxu1 }
 0x105   :  { %v3938_v60 = vpop.f32.mrb[1].mxu1 }
 0x106   :  { %v3940_v61 = vpop.f32.mrb[2].mxu1 }
 0x107   :  { %v3942_v62 = vpop.f32.mrb[3].mxu1 }
 0x10d   :  { %v3944_v63 = vpop.f32.mrb[4].mxu1 }
 0x10e   :  { %v3946_v0 = vpop.f32.mrb[5].mxu1 }
 0x10f   :  { %v3948_v1 = vpop.f32.mrb[6].mxu1 }
 0x110   :  { %v3950_v2 = vpop.f32.mrb[7].mxu1 }
 0x115   :  { %v3952_v4 = vpop.f32.mrb[8].mxu1 }
 0x116   :  { %v3954_v5 = vpop.f32.mrb[9].mxu1 }
 0x117   :  { %v3956_v6 = vpop.f32.mrb[10].mxu1 }
 0x118   :  { %v3958_v8 = vpop.f32.mrb[11].mxu1 }
 0x11d   :  { %v3967_v12 = vpop.f32.mrb[12].mxu1 }
 0x11e   :  { %v3969_v13 = vpop.f32.mrb[13].mxu1 }
 0x11f   :  { %v3971_v14 = vpop.f32.mrb[14].mxu1 }
 0x120   :  { %v3976_v16 = vpop.f32.mrb[15].mxu1 }
 0x124   :  { %v376_v18 = vpop.f32.mrb[0].mxu0 }
 0x125   :  { %v467_v19 = vadd.f32 %v3974_v15, %v376_v18  ;;  %v378_v20 = vpop.f32.mrb[1].mxu0  ;;  %v3480_v18 = vld [vmem:[#allocation2 + $0x40] ss:$8 sps:$4 sm:$0xff]  }
 0x126   :  { %v3983_v21 = vadd.f32 %v3979_v17, %v378_v20  ;;  %v380_v22 = vpop.f32.mrb[2].mxu0  ;;  %v3485_v20 = vld [vmem:[#allocation2 + $0x54] ss:$8 sps:$4 sm:$0xff]  }
 0x127   :  { %v469_v23 = vadd.f32 %v3974_v15, %v380_v22  ;;  %v382_v24 = vpop.f32.mrb[3].mxu0  ;;  %v499_v25 = vmax.f32 %v467_v19, 0.0 }
 0x128   :  { %v3987_v26 = vadd.f32 %v3979_v17, %v382_v24 }
 0x129   :  { %v500_v27 = vmax.f32 %v469_v23, 0.0  ;;  %v531_v30 = vpack.c.bf16 %v499_v25, %v3739_v45 }
 0x12b   :  { %v532_v28 = vpack.c.bf16 %v500_v27, %v499_v25 }
 0x12c   :  { %v386_v31 = vpop.f32.mrb[4].mxu0 }
 0x12d   :  { %v471_v33 = vadd.f32 %v3974_v15, %v386_v31  ;;  %v388_v34 = vpop.f32.mrb[5].mxu0  ;;  %712 = vmatprep.mubr.bf16.mxu1 %v532_v28 }
 0x12e   :  { %v3992_v35 = vadd.f32 %v3979_v17, %v388_v34  ;;  %v390_v36 = vpop.f32.mrb[6].mxu0  ;;  %713 = vmatmul.mubr.bf16.vlgmr.msra.gmra.mrb[16].mxu1 %v531_v30  ;;  %v3483_v30 = vld [vmem:[#allocation2 + $0x50] ss:$8 sps:$4 sm:$0xff]  }
 0x12f   :  { %v501_v37 = vmax.f32 %v471_v33, 0.0  ;;  %v473_v38 = vadd.f32 %v3974_v15, %v390_v36  ;;  %v392_v39 = vpop.f32.mrb[7].mxu0  ;;  %1079 = vmatpush1.bf16.msra.mxu1 %v3468_v29 }
 0x130   :  { %v3996_v41 = vadd.f32 %v3979_v17, %v392_v39  ;;  %1080 = vmatprep.subr.bf16.mxu1 %v3473_v32  ;;  %v3488_v32 = vld [vmem:[#allocation2 + $0x64] ss:$8 sps:$4 sm:$0xff]   ;;  %v3491_v39 = vld [vmem:[#allocation2 + $0x74] ss:$8 sps:$4 sm:$0xff]  }
 0x131   :  { %v533_v43 = vpack.c.bf16 %v501_v37, %v500_v27  ;;  %v502_v44 = vmax.f32 %v473_v38, 0.0 }
 0x133   :  { %v534_v45 = vpack.c.bf16 %v502_v44, %v501_v37  ;;  %1081 = vmatpush1.bf16.msra.mxu1 %v3471_v40  ;;  %v3486_v37 = vld [vmem:[#allocation2 + $0x60] ss:$8 sps:$4 sm:$0xff]  }
 0x134   :  { %v396_v47 = vpop.f32.mrb[8].mxu0  ;;  %1082 = vmatprep.subr.bf16.mxu1 %v3476_v42 }
 0x135   :  { %v475_v49 = vadd.f32 %v3974_v15, %v396_v47  ;;  %v398_v50 = vpop.f32.mrb[9].mxu0  ;;  %720 = vmatprep.mubr.bf16.mxu1 %v534_v45 }
 0x136   :  { %v4000_v51 = vadd.f32 %v3979_v17, %v398_v50  ;;  %v400_v52 = vpop.f32.mrb[10].mxu0  ;;  %721 = vmatmul.mubr.bf16.gmra.mrb[20].mxu1 %v533_v43 }
 0x137   :  { %v503_v53 = vmax.f32 %v475_v49, 0.0  ;;  %v477_v54 = vadd.f32 %v3974_v15, %v400_v52  ;;  %v402_v55 = vpop.f32.mrb[11].mxu0  ;;  %1083 = vmatpush1.bf16.msra.mxu1 %v3474_v46 }
 0x138   :  { %v4004_v57 = vadd.f32 %v3979_v17, %v402_v55  ;;  %1084 = vmatprep.subr.bf16.mxu1 %v3479_v48  ;;  %v3489_v48 = vld [vmem:[#allocation2 + $0x70] ss:$8 sps:$4 sm:$0xff]  }
 0x139   :  { %v535_v3 = vpack.c.bf16 %v503_v53, %v502_v44  ;;  %v504_v7 = vmax.f32 %v477_v54, 0.0 }
 0x13b   :  { %v536_v10 = vpack.c.bf16 %v504_v7, %v503_v53  ;;  %1085 = vmatpush1.bf16.msra.mxu1 %v3477_v56 }
 0x13c   :  { %v406_v19 = vpop.f32.mrb[12].mxu0  ;;  %1086 = vmatprep.subr.bf16.mxu1 %v3482_v58  ;;  %v3497_v58 = vld [vmem:[#allocation2 + $0x94] ss:$8 sps:$4 sm:$0xff]  }
 0x13d   :  { %v479_v22 = vadd.f32 %v3974_v15, %v406_v19  ;;  %v408_v23 = vpop.f32.mrb[13].mxu0  ;;  %728 = vmatprep.mubr.bf16.mxu1 %v536_v10 }
 0x13e   :  { %v4008_v24 = vadd.f32 %v3979_v17, %v408_v23  ;;  %v410_v25 = vpop.f32.mrb[14].mxu0  ;;  %729 = vmatmul.mubr.bf16.gmra.mrb[24].mxu1 %v535_v3  ;;  %v3495_v23 = vld [vmem:[#allocation2 + $0x90] ss:$8 sps:$4 sm:$0xff]  }
 0x13f   :  { %v505_v27 = vmax.f32 %v479_v22, 0.0  ;;  %v481_v28 = vadd.f32 %v3974_v15, %v410_v25  ;;  %v412_v29 = vpop.f32.mrb[15].mxu0  ;;  %1087 = vmatpush1.bf16.msra.mxu1 %v3480_v18 }
 0x140   :  { %v4012_v31 = vadd.f32 %v3979_v17, %v412_v29  ;;  %1088 = vmatprep.subr.bf16.mxu1 %v3485_v20 }
 0x141   :  { %v537_v33 = vpack.c.bf16 %v505_v27, %v504_v7  ;;  %v506_v34 = vmax.f32 %v481_v28, 0.0 }
 0x143   :  { %v538_v36 = vpack.c.bf16 %v506_v34, %v505_v27  ;;  %1089 = vmatpush1.bf16.msra.mxu1 %v3483_v30 }
 0x144   :  { %v416_v38 = vpop.f32.mrb[16].mxu0  ;;  %1090 = vmatprep.subr.bf16.mxu1 %v3488_v32  ;;  %v3498_v32 = vld [vmem:[#allocation2 + $0xa0] ss:$8 sps:$4 sm:$0xff]  }
 0x145   :  { %v417_v40 = vadd.f32 %v416_v38, %v3936_v59  ;;  %v418_v42 = vpop.f32.mrb[17].mxu0  ;;  %736 = vmatprep.mubr.bf16.mxu1 %v538_v36  ;;  %v3494_v59 = vld [vmem:[#allocation2 + $0x84] ss:$8 sps:$4 sm:$0xff]  }
 0x146   :  { %v419_v43 = vadd.f32 %v418_v42, %v3938_v60  ;;  %v420_v44 = vpop.f32.mrb[18].mxu0  ;;  %737 = vmatmul.mubr.bf16.gmra.mrb[28].mxu1 %v537_v33 }
 0x147   :  { %v483_v45 = vadd.f32 %v3974_v15, %v417_v40  ;;  %v421_v46 = vadd.f32 %v420_v44, %v3940_v61  ;;  %v422_v47 = vpop.f32.mrb[19].mxu0  ;;  %1091 = vmatpush1.bf16.msra.mxu1 %v3486_v37  ;;  %v3492_v61 = vld [vmem:[#allocation2 + $0x80] ss:$8 sps:$4 sm:$0xff]   ;;  %v3501_v44 = vld [vmem:[#allocation2 + $0xb0] ss:$8 sps:$4 sm:$0xff]  }
 0x148   :  { %v4019_v49 = vadd.f32 %v3979_v17, %v419_v43  ;;  %v423_v50 = vadd.f32 %v422_v47, %v3942_v62  ;;  %1092 = vmatprep.subr.bf16.mxu1 %v3491_v39 }
 0x149   :  { %v507_v52 = vmax.f32 %v483_v45, 0.0  ;;  %v485_v53 = vadd.f32 %v3974_v15, %v421_v46 }
 0x14a   :  { %v4024_v60 = vadd.f32 %v3979_v17, %v423_v50 }
 0x14b   :  { %v508_v54 = vmax.f32 %v485_v53, 0.0  ;;  %v539_v55 = vpack.c.bf16 %v507_v52, %v506_v34  ;;  %1093 = vmatpush1.bf16.msra.mxu1 %v3489_v48  ;;  %v3503_v34 = vld [vmem:[#allocation2 + $0xb4] ss:$8 sps:$4 sm:$0xff]  }
 0x14c   :  { %v426_v56 = vpop.f32.mrb[20].mxu0  ;;  %1094 = vmatprep.subr.bf16.mxu1 %v3494_v59 }
 0x14d   :  { %v427_v3 = vadd.f32 %v426_v56, %v3944_v63  ;;  %v428_v7 = vpop.f32.mrb[21].mxu0  ;;  %v540_v10 = vpack.c.bf16 %v508_v54, %v507_v52  ;;  %v3500_v63 = vld [vmem:[#allocation2 + $0xa4] ss:$8 sps:$4 sm:$0xff]  }
 0x14e   :  { %v429_v62 = vadd.f32 %v428_v7, %v3946_v0  ;;  %v430_v18 = vpop.f32.mrb[22].mxu0 }
 0x14f   :  { %v487_v19 = vadd.f32 %v3974_v15, %v427_v3  ;;  %v431_v20 = vadd.f32 %v430_v18, %v3948_v1  ;;  %v432_v22 = vpop.f32.mrb[23].mxu0  ;;  %744 = vmatprep.mubr.bf16.mxu1 %v540_v10  ;;  %1095 = vmatpush1.bf16.msra.mxu1 %v3492_v61 }
 0x150   :  { %v4031_v25 = vadd.f32 %v3979_v17, %v429_v62  ;;  %v433_v27 = vadd.f32 %v432_v22, %v3950_v2  ;;  %745 = vmatmul.mubr.bf16.gmra.mrb[32].mxu1 %v539_v55  ;;  %1096 = vmatprep.subr.bf16.mxu1 %v3497_v58  ;;  %v3507_v22 = vld [vmem:[#allocation2 + $0xd0] ss:$8 sps:$4 sm:$0xff]  }
 0x151   :  { %v509_v28 = vmax.f32 %v487_v19, 0.0  ;;  %v489_v0 = vadd.f32 %v3974_v15, %v431_v20  ;;  %v3504_v19 = vld [vmem:[#allocation2 + $0xc0] ss:$8 sps:$4 sm:$0xff]   ;;  %v3509_v20 = vld [vmem:[#allocation2 + $0xd4] ss:$8 sps:$4 sm:$0xff]  }
 0x152   :  { %v4036_v29 = vadd.f32 %v3979_v17, %v433_v27  ;;  %v3516_v27 = vld [vmem:[#allocation5 + $0xc0] sm:$0xff]  }
 0x153   :  { %v510_v30 = vmax.f32 %v489_v0, 0.0  ;;  %v541_v1 = vpack.c.bf16 %v509_v28, %v508_v54  ;;  %1097 = vmatpush1.bf16.msra.mxu1 %v3495_v23  ;;  %v3510_v23 = vld [vmem:[#allocation2 + $0xe0] ss:$8 sps:$4 sm:$0xff]   ;;  %3202 = vmatprep.subr.bf16.mxu0 %v3516_v27 }
 0x154   :  { %v436_v33 = vpop.f32.mrb[24].mxu0  ;;  %1098 = vmatprep.subr.bf16.mxu1 %v3500_v63  ;;  %v3517_v63 = vld [vmem:[#allocation5 + $0x80] sm:$0xff]   ;;  %v3519_v0 = vld [vmem:[#allocation5 + $0x88] sm:$0xff]  }
 0x155   :  { %v437_v36 = vadd.f32 %v436_v33, %v3952_v4  ;;  %v438_v37 = vpop.f32.mrb[25].mxu0  ;;  %v542_v2 = vpack.c.bf16 %v510_v30, %v509_v28  ;;  %v3518_v28 = vld [vmem:[#allocation5 + $0xc8] sm:$0xff]   ;;  %3203 = vmatpush3.bf16.msra.mxu0 %v3517_v63  ;;  %v3523_v33 = vld [vmem:[#allocation5 + $0x98] sm:$0xff]  }
 0x156   :  { %v439_v38 = vadd.f32 %v438_v37, %v3954_v5  ;;  %v440_v39 = vpop.f32.mrb[26].mxu0  ;;  %3204 = vmatprep.subr.bf16.mxu0 %v3518_v28  ;;  %v3526_v37 = vld [vmem:[#allocation5 + $0xe8] sm:$0xff]  }
 0x157   :  { %v491_v40 = vadd.f32 %v3974_v15, %v437_v36  ;;  %v441_v42 = vadd.f32 %v440_v39, %v3956_v6  ;;  %v442_v43 = vpop.f32.mrb[27].mxu0  ;;  %752 = vmatprep.mubr.bf16.mxu1 %v542_v2  ;;  %1099 = vmatpush1.bf16.msra.mxu1 %v3498_v32  ;;  %v3522_v32 = vld [vmem:[#allocation5 + $0xd8] sm:$0xff]   ;;  %v3525_v36 = vld [vmem:[#allocation5 + $0xa0] sm:$0xff]   ;;  %v3527_v2 = vld [vmem:[#allocation5 + $0xa8] sm:$0xff]  }
 0x158   :  { %v4043_v45 = vadd.f32 %v3979_v17, %v439_v38  ;;  %v443_v46 = vadd.f32 %v442_v43, %v3958_v8  ;;  %753 = vmatmul.mubr.bf16.gmra.mrb[36].mxu1 %v541_v1  ;;  %1100 = vmatprep.subr.bf16.mxu1 %v3503_v34  ;;  %v3521_v1 = vld [vmem:[#allocation5 + $0x90] sm:$0xff]   ;;  %v3524_v34 = vld [vmem:[#allocation5 + $0xe0] sm:$0xff]  }
 0x159   :  { %v511_v4 = vmax.f32 %v491_v40, 0.0  ;;  %v493_v47 = vadd.f32 %v3974_v15, %v441_v42  ;;  %3205 = vmatpush3.bf16.msra.mxu0 %v3519_v0  ;;  %v3528_v38 = vld [vmem:[#allocation5 + $0xf0] sm:$0xff]   ;;  %v4065_v42 = vld [vmem:[%s4490_s4 + $0x1] ss:$0 sm:$0xff] }
 0x15a   :  { %v4048_v5 = vadd.f32 %v3979_v17, %v443_v46  ;;  %v3529_v39 = vld [vmem:[#allocation5 + $0xb0] sm:$0xff]  }
 0x15b   :  { %v512_v48 = vmax.f32 %v493_v47, 0.0  ;;  %v543_v50 = vpack.c.bf16 %v511_v4, %v510_v30  ;;  %1101 = vmatpush1.bf16.msra.mxu1 %v3501_v44  ;;  %v3520_v30 = vld [vmem:[#allocation5 + $0xd0] sm:$0xff]  }
 0x15c   :  { %v446_v6 = vpop.f32.mrb[28].mxu0  ;;  %3206 = vmatprep.subr.bf16.mxu0 %v3520_v30 }
 0x15d   :  { %v447_v59 = vadd.f32 %v446_v6, %v3967_v12  ;;  %v448_v52 = vpop.f32.mrb[29].mxu0  ;;  %v544_v53 = vpack.c.bf16 %v512_v48, %v511_v4  ;;  %3207 = vmatpush3.bf16.msra.mxu0 %v3521_v1 }
 0x15e   :  { %v449_v54 = vadd.f32 %v448_v52, %v3969_v13  ;;  %v450_v55 = vpop.f32.mrb[30].mxu0  ;;  %3208 = vmatprep.subr.bf16.mxu0 %v3522_v32 }
 0x15f   :  { %v495_v8 = vadd.f32 %v3974_v15, %v447_v59  ;;  %v451_v61 = vadd.f32 %v450_v55, %v3971_v14  ;;  %v452_v56 = vpop.f32.mrb[31].mxu0  ;;  %760 = vmatprep.mubr.bf16.mxu1 %v544_v53  ;;  %v3506_v14 = vld [vmem:[#allocation2 + $0xc4] ss:$8 sps:$4 sm:$0xff]  }
 0x160   :  { %v4055_v58 = vadd.f32 %v3979_v17, %v449_v54  ;;  %v453_v3 = vadd.f32 %v452_v56, %v3976_v16  ;;  %761 = vmatmul.mubr.bf16.gmra.mrb[40].mxu1 %v543_v50  ;;  %1102 = vmatprep.subr.bf16.mxu1 %v3506_v14  ;;  %v3512_v16 = vld [vmem:[#allocation2 + $0xe4] ss:$8 sps:$4 sm:$0xff]  }
 0x161   :  { %v513_v7 = vmax.f32 %v495_v8, 0.0  ;;  %v497_v12 = vadd.f32 %v3974_v15, %v451_v61  ;;  %1103 = vmatpush1.bf16.msra.mxu1 %v3504_v19  ;;  %v3515_v15 = vld [vmem:[#allocation2 + $0xf4] ss:$8 sps:$4 sm:$0xff]   ;;  %3209 = vmatpush3.bf16.msra.mxu0 %v3523_v33 }
 0x162   :  { %v4060_v10 = vadd.f32 %v3979_v17, %v453_v3  ;;  %1104 = vmatprep.subr.bf16.mxu1 %v3509_v20  ;;  %v3513_v17 = vld [vmem:[#allocation2 + $0xf0] ss:$8 sps:$4 sm:$0xff]   ;;  %3210 = vmatprep.subr.bf16.mxu0 %v3524_v34 }
 0x163   :  { %v514_v13 = vmax.f32 %v497_v12, 0.0  ;;  %v545_v62 = vpack.c.bf16 %v513_v7, %v512_v48 }
 0x165   :  { %v546_v18 = vpack.c.bf16 %v514_v13, %v513_v7  ;;  %1105 = vmatpush1.bf16.msra.mxu1 %v3507_v22  ;;  %3211 = vmatpush3.bf16.msra.mxu0 %v3525_v36 }
 0x166   :  { %1106 = vmatprep.subr.bf16.mxu1 %v3512_v16  ;;  %3212 = vmatprep.subr.bf16.mxu0 %v3526_v37  ;;  %v3740_v16 = vmov 0.0|0.0  }
 0x167   :  { %768 = vmatprep.mubr.bf16.mxu1 %v546_v18 }
 0x168   :  { %769 = vmatmul.mubr.bf16.gmra.mrb[44].mxu1 %v545_v62 }
 0x169   :  { %1107 = vmatpush1.bf16.msra.mxu1 %v3510_v23  ;;  %3213 = vmatpush3.bf16.msra.mxu0 %v3527_v2 }
 0x16a   :  { %1108 = vmatprep.subr.bf16.mxu1 %v3515_v15  ;;  %3214 = vmatprep.subr.bf16.mxu0 %v3528_v38 }
 0x16d   :  { %1109 = vmatpush1.bf16.msra.mxu1 %v3513_v17  ;;  %3215 = vmatpush3.bf16.msra.mxu0 %v3529_v39 }
 0x201   :  { %v3154_v40 = vpop.f32.mrb[16].mxu1 }
 0x202   :  { %v3155_v43 = vpop.f32.mrb[17].mxu1 }
 0x203   :  { %v3156_v44 = vadd.f32 %v3155_v43, %v3154_v40  ;;  %v3157_v46 = vpop.f32.mrb[18].mxu1 }
 0x204   :  { %v3158_v4 = vpop.f32.mrb[19].mxu1 }
 0x205   :  { %v715_v47 = vadd.f32 %v3156_v44, %v4065_v42  ;;  %v3159_v48 = vadd.f32 %v3158_v4, %v3157_v46 }
 0x207   :  { %v777_v50 = vmax.f32 %v715_v47, 0.0  ;;  %v718_v6 = vadd.f32 %v3159_v48, %v4065_v42 }
 0x209   :  { %v793_v59 = vadd.f32 %v777_v50, %v3983_v21  ;;  %v778_v52 = vmax.f32 %v718_v6, 0.0  ;;  %v3160_v53 = vpop.f32.mrb[20].mxu1 }
 0x20a   :  { %v3161_v54 = vpop.f32.mrb[21].mxu1 }
 0x20b   :  { %v794_v55 = vadd.f32 %v778_v52, %v3987_v26  ;;  %v3162_v8 = vadd.f32 %v3161_v54, %v3160_v53  ;;  %v3163_v61 = vpop.f32.mrb[22].mxu1  ;;  %v809_v3 = vmax.f32 %v793_v59, 0.0 }
 0x20c   :  { %v3164_v56 = vpop.f32.mrb[23].mxu1 }
 0x20d   :  { %v810_v7 = vmax.f32 %v794_v55, 0.0  ;;  %v723_v12 = vadd.f32 %v3162_v8, %v4065_v42  ;;  %v3165_v13 = vadd.f32 %v3164_v56, %v3163_v61 }
 0x20f   :  { %v779_v62 = vmax.f32 %v723_v12, 0.0  ;;  %v726_v18 = vadd.f32 %v3165_v13, %v4065_v42  ;;  %v858_v14 = vpack.c.bf16 %v810_v7, %v809_v3 }
 0x211   :  { %v795_v19 = vadd.f32 %v779_v62, %v3992_v35  ;;  %v780_v21 = vmax.f32 %v726_v18, 0.0  ;;  %v3166_v20 = vpop.f32.mrb[24].mxu1  ;;  %1110 = vmatprep.mubr.bf16.mxu1 %v858_v14 }
 0x212   :  { %v3167_v22 = vpop.f32.mrb[25].mxu1  ;;  %1111 = vmatmul.mubr.bf16.vlgmr.msra.gmra.mrb[48].mxu1 %v3740_v16 }
 0x213   :  { %v796_v26 = vadd.f32 %v780_v21, %v3996_v41  ;;  %v3168_v23 = vadd.f32 %v3167_v22, %v3166_v20  ;;  %v3169_v15 = vpop.f32.mrb[26].mxu1  ;;  %v811_v27 = vmax.f32 %v795_v19, 0.0 }
 0x214   :  { %v3170_v17 = vpop.f32.mrb[27].mxu1 }
 0x215   :  { %v812_v63 = vmax.f32 %v796_v26, 0.0  ;;  %v731_v28 = vadd.f32 %v3168_v23, %v4065_v42  ;;  %v3171_v0 = vadd.f32 %v3170_v17, %v3169_v15 }
 0x217   :  { %v781_v30 = vmax.f32 %v731_v28, 0.0  ;;  %v734_v35 = vadd.f32 %v3171_v0, %v4065_v42  ;;  %v860_v1 = vpack.c.bf16 %v812_v63, %v811_v27 }
 0x219   :  { %v797_v32 = vadd.f32 %v781_v30, %v4000_v51  ;;  %v782_v33 = vmax.f32 %v734_v35, 0.0  ;;  %v3172_v34 = vpop.f32.mrb[28].mxu1  ;;  %1120 = vmatprep.mubr.bf16.mxu1 %v860_v1 }
 0x21a   :  { %v3173_v36 = vpop.f32.mrb[29].mxu1  ;;  %1121 = vmatmul.mubr.bf16.gmra.mrb[52].mxu1 %v858_v14 }
 0x21b   :  { %v798_v41 = vadd.f32 %v782_v33, %v4004_v57  ;;  %v3174_v37 = vadd.f32 %v3173_v36, %v3172_v34  ;;  %v3175_v2 = vpop.f32.mrb[30].mxu1  ;;  %v813_v39 = vmax.f32 %v797_v32, 0.0 }
 0x21c   :  { %v3176_v38 = vpop.f32.mrb[31].mxu1 }
 0x21d   :  { %v814_v40 = vmax.f32 %v798_v41, 0.0  ;;  %v739_v43 = vadd.f32 %v3174_v37, %v4065_v42  ;;  %v3177_v44 = vadd.f32 %v3176_v38, %v3175_v2 }
 0x21f   :  { %v783_v46 = vmax.f32 %v739_v43, 0.0  ;;  %v742_v4 = vadd.f32 %v3177_v44, %v4065_v42  ;;  %v862_v47 = vpack.c.bf16 %v814_v40, %v813_v39 }
 0x221   :  { %v799_v51 = vadd.f32 %v783_v46, %v4008_v24  ;;  %v784_v48 = vmax.f32 %v742_v4, 0.0  ;;  %1130 = vmatprep.mubr.bf16.mxu1 %v862_v47 }
 0x222   :  { %1131 = vmatmul.mubr.bf16.gmra.mrb[56].mxu1 %v860_v1 }
 0x223   :  { %v800_v50 = vadd.f32 %v784_v48, %v4012_v31  ;;  %v3178_v57 = vpop.f32.mrb[32].mxu1  ;;  %v815_v59 = vmax.f32 %v799_v51, 0.0 }
 0x224   :  { %v3179_v6 = vpop.f32.mrb[33].mxu1 }
 0x225   :  { %v816_v52 = vmax.f32 %v800_v50, 0.0  ;;  %v3180_v53 = vadd.f32 %v3179_v6, %v3178_v57  ;;  %v3181_v54 = vpop.f32.mrb[34].mxu1 }
 0x226   :  { %v3182_v55 = vpop.f32.mrb[35].mxu1 }
 0x227   :  { %v747_v8 = vadd.f32 %v3180_v53, %v4065_v42  ;;  %v3183_v61 = vadd.f32 %v3182_v55, %v3181_v54  ;;  %v864_v56 = vpack.c.bf16 %v816_v52, %v815_v59  ;;  %v3530_v54 = vld [vmem:[#allocation5 + $0xf8] sm:$0xff]  }
 0x228   :  { %v3531_v55 = vld [vmem:[#allocation5 + $0xb8] sm:$0xff]   ;;  %3216 = vmatprep.subr.bf16.mxu0 %v3530_v54 }
 0x229   :  { %v785_v3 = vmax.f32 %v747_v8, 0.0  ;;  %v750_v7 = vadd.f32 %v3183_v61, %v4065_v42  ;;  %1140 = vmatprep.mubr.bf16.mxu1 %v864_v56  ;;  %3217 = vmatpush3.bf16.msra.mxu0 %v3531_v55  ;;  %v3532_v8 = vld [vmem:[#allocation2 + $0x100] ss:$8 sps:$4 sm:$0xff]   ;;  %v3534_v61 = vld [vmem:[#allocation2 + $0x104] ss:$8 sps:$4 sm:$0xff]  }
 0x22a   :  { %1141 = vmatmul.mubr.bf16.gmra.mrb[60].mxu1 %v862_v47  ;;  %1772 = vmatprep.subr.bf16.mxu1 %v3534_v61 }
 0x22b   :  { %v801_v24 = vadd.f32 %v785_v3, %v4019_v49  ;;  %v786_v12 = vmax.f32 %v750_v7, 0.0  ;;  %v3184_v31 = vpop.f32.mrb[36].mxu1  ;;  %1773 = vmatpush1.bf16.msra.mxu1 %v3532_v8  ;;  %v3538_v3 = vld [vmem:[#allocation2 + $0x120] ss:$8 sps:$4 sm:$0xff]   ;;  %v3541_v7 = vld [vmem:[#allocation2 + $0x130] ss:$8 sps:$4 sm:$0xff]  }
 0x22c   :  { %v3185_v13 = vpop.f32.mrb[37].mxu1 }
 0x22d   :  { %v802_v62 = vadd.f32 %v786_v12, %v4024_v60  ;;  %v3186_v18 = vadd.f32 %v3185_v13, %v3184_v31  ;;  %v3187_v14 = vpop.f32.mrb[38].mxu1  ;;  %v817_v21 = vmax.f32 %v801_v24, 0.0  ;;  %v3546_v24 = vld [vmem:[#allocation2 + $0x144] ss:$8 sps:$4 sm:$0xff]   ;;  %v3544_v12 = vld [vmem:[#allocation2 + $0x140] ss:$8 sps:$4 sm:$0xff]  }
 0x22e   :  { %v3188_v19 = vpop.f32.mrb[39].mxu1  ;;  %v3549_v31 = vld [vmem:[#allocation2 + $0x154] ss:$8 sps:$4 sm:$0xff]   ;;  %v3547_v13 = vld [vmem:[#allocation2 + $0x150] ss:$8 sps:$4 sm:$0xff]  }
 0x22f   :  { %v818_v20 = vmax.f32 %v802_v62, 0.0  ;;  %v755_v22 = vadd.f32 %v3186_v18, %v4065_v42  ;;  %v3189_v26 = vadd.f32 %v3188_v19, %v3187_v14  ;;  %v3552_v62 = vld [vmem:[#allocation2 + $0x164] ss:$8 sps:$4 sm:$0xff]   ;;  %v3550_v18 = vld [vmem:[#allocation2 + $0x160] ss:$8 sps:$4 sm:$0xff]  }
 0x230   :  { %v3555_v14 = vld [vmem:[#allocation2 + $0x174] ss:$8 sps:$4 sm:$0xff]   ;;  %v3553_v19 = vld [vmem:[#allocation2 + $0x170] ss:$8 sps:$4 sm:$0xff]  }
 0x231   :  { %v787_v23 = vmax.f32 %v755_v22, 0.0  ;;  %v758_v15 = vadd.f32 %v3189_v26, %v4065_v42  ;;  %v866_v17 = vpack.c.bf16 %v818_v20, %v817_v21  ;;  %v3558_v21 = vld [vmem:[#allocation2 + $0x184] ss:$8 sps:$4 sm:$0xff]   ;;  %v3556_v20 = vld [vmem:[#allocation2 + $0x180] ss:$8 sps:$4 sm:$0xff]  }
 0x232   :  { %v3561_v22 = vld [vmem:[#allocation2 + $0x194] ss:$8 sps:$4 sm:$0xff]   ;;  %v3559_v26 = vld [vmem:[#allocation2 + $0x190] ss:$8 sps:$4 sm:$0xff]  }
 0x233   :  { %v803_v27 = vadd.f32 %v787_v23, %v4031_v25  ;;  %v788_v49 = vmax.f32 %v758_v15, 0.0  ;;  %v3190_v63 = vpop.f32.mrb[40].mxu1  ;;  %1150 = vmatprep.mubr.bf16.mxu1 %v866_v17  ;;  %v3564_v23 = vld [vmem:[#allocation2 + $0x1a4] ss:$8 sps:$4 sm:$0xff]   ;;  %v3562_v15 = vld [vmem:[#allocation2 + $0x1a0] ss:$8 sps:$4 sm:$0xff]  }
 0x234   :  { %v3191_v28 = vpop.f32.mrb[41].mxu1  ;;  %1151 = vmatmul.mubr.bf16.gmra.mrb[64].mxu1 %v864_v56  ;;  %v3540_v56 = vld [vmem:[#allocation2 + $0x124] ss:$8 sps:$4 sm:$0xff]  }
 0x235   :  { %v804_v60 = vadd.f32 %v788_v49, %v4036_v29  ;;  %v3192_v0 = vadd.f32 %v3191_v28, %v3190_v63  ;;  %v3193_v30 = vpop.f32.mrb[42].mxu1  ;;  %v819_v1 = vmax.f32 %v803_v27, 0.0  ;;  %v3565_v27 = vld [vmem:[#allocation2 + $0x1b0] ss:$8 sps:$4 sm:$0xff]  }
 0x236   :  { %v3194_v35 = vpop.f32.mrb[43].mxu1  ;;  %v4103_v49 = vld [vmem:[%s4490_s4 + $0x4] ss:$2 sm:$0x3] }
 0x237   :  { %v820_v32 = vmax.f32 %v804_v60, 0.0  ;;  %v763_v33 = vadd.f32 %v3192_v0, %v4065_v42  ;;  %v3195_v34 = vadd.f32 %v3194_v35, %v3193_v30  ;;  %v4107_v63 = vrot.slane %v4103_v49, %v3960_v9 }
 0x239   :  { %v789_v36 = vmax.f32 %v763_v33, 0.0  ;;  %v766_v41 = vadd.f32 %v3195_v34, %v4065_v42  ;;  %v868_v37 = vpack.c.bf16 %v820_v32, %v819_v1 }
 0x23b   :  { %v805_v25 = vadd.f32 %v789_v36, %v4043_v45  ;;  %v790_v2 = vmax.f32 %v766_v41, 0.0  ;;  %v3196_v38 = vpop.f32.mrb[44].mxu1  ;;  %1160 = vmatprep.mubr.bf16.mxu1 %v868_v37 }
 0x23c   :  { %v3197_v39 = vpop.f32.mrb[45].mxu1  ;;  %1161 = vmatmul.mubr.bf16.gmra.mrb[68].mxu1 %v866_v17  ;;  %v3567_v17 = vld [vmem:[#allocation2 + $0x1b4] ss:$8 sps:$4 sm:$0xff]  }
 0x23d   :  { %v806_v29 = vadd.f32 %v790_v2, %v4048_v5  ;;  %v3198_v40 = vadd.f32 %v3197_v39, %v3196_v38  ;;  %v3199_v43 = vpop.f32.mrb[46].mxu1  ;;  %v821_v46 = vmax.f32 %v805_v25, 0.0 }
 0x23e   :  { %v3200_v44 = vpop.f32.mrb[47].mxu1 }
 0x23f   :  { %v822_v4 = vmax.f32 %v806_v29, 0.0  ;;  %v771_v47 = vadd.f32 %v3198_v40, %v4065_v42  ;;  %v3201_v51 = vadd.f32 %v3200_v44, %v3199_v43 }
 0x241   :  { %v791_v48 = vmax.f32 %v771_v47, 0.0  ;;  %v774_v50 = vadd.f32 %v3201_v51, %v4065_v42  ;;  %v870_v57 = vpack.c.bf16 %v822_v4, %v821_v46  ;;  %v3537_v42 = vld [vmem:[#allocation2 + $0x114] ss:$8 sps:$4 sm:$0xff]  }
 0x242   :  { %1774 = vmatprep.subr.bf16.mxu1 %v3537_v42 }
 0x243   :  { %v807_v45 = vadd.f32 %v791_v48, %v4055_v58  ;;  %v792_v6 = vmax.f32 %v774_v50, 0.0  ;;  %1170 = vmatprep.mubr.bf16.mxu1 %v870_v57  ;;  %v3535_v58 = vld [vmem:[#allocation2 + $0x110] ss:$8 sps:$4 sm:$0xff]  }
 0x244   :  { %1171 = vmatmul.mubr.bf16.gmra.mrb[72].mxu1 %v868_v37 }
 0x245   :  { %v808_v59 = vadd.f32 %v792_v6, %v4060_v10  ;;  %v823_v5 = vmax.f32 %v807_v45, 0.0  ;;  %1775 = vmatpush1.bf16.msra.mxu1 %v3535_v58  ;;  %v3543_v10 = vld [vmem:[#allocation2 + $0x134] ss:$8 sps:$4 sm:$0xff]  }
 0x246   :  { %1776 = vmatprep.subr.bf16.mxu1 %v3540_v56 }
 0x247   :  { %v824_v52 = vmax.f32 %v808_v59, 0.0 }
 0x249   :  { %v872_v53 = vpack.c.bf16 %v824_v52, %v823_v5  ;;  %1777 = vmatpush1.bf16.msra.mxu1 %v3538_v3 }
 0x24a   :  { %1778 = vmatprep.subr.bf16.mxu1 %v3543_v10 }
 0x24b   :  { %1180 = vmatprep.mubr.bf16.mxu1 %v872_v53 }
 0x24c   :  { %1181 = vmatmul.mubr.bf16.gmra.mrb[76].mxu1 %v870_v57 }
 0x24d   :  { %1779 = vmatpush1.bf16.msra.mxu1 %v3541_v7 }
 0x24e   :  { %1780 = vmatprep.subr.bf16.mxu1 %v3546_v24 }
 0x251   :  { %1781 = vmatpush1.bf16.msra.mxu1 %v3544_v12 }
 0x252   :  { %1782 = vmatprep.subr.bf16.mxu1 %v3549_v31 }
 0x255   :  { %1783 = vmatpush1.bf16.msra.mxu1 %v3547_v13 }
 0x256   :  { %1784 = vmatprep.subr.bf16.mxu1 %v3552_v62 }
 0x259   :  { %1785 = vmatpush1.bf16.msra.mxu1 %v3550_v18 }
 0x25a   :  { %1786 = vmatprep.subr.bf16.mxu1 %v3555_v14 }
 0x25d   :  { %1787 = vmatpush1.bf16.msra.mxu1 %v3553_v19 }
 0x25e   :  { %1788 = vmatprep.subr.bf16.mxu1 %v3558_v21 }
 0x261   :  { %1789 = vmatpush1.bf16.msra.mxu1 %v3556_v20 }
 0x262   :  { %1790 = vmatprep.subr.bf16.mxu1 %v3561_v22 }
 0x265   :  { %1791 = vmatpush1.bf16.msra.mxu1 %v3559_v26 }
 0x266   :  { %1792 = vmatprep.subr.bf16.mxu1 %v3564_v23 }
 0x269   :  { %1793 = vmatpush1.bf16.msra.mxu1 %v3562_v15 }
 0x26a   :  { %1794 = vmatprep.subr.bf16.mxu1 %v3567_v17 }
 0x26d   :  { %1795 = vmatpush1.bf16.msra.mxu1 %v3565_v27 }
 0x2e5   :  { %v1112_v28 = vpop.f32.mrb[48].mxu1 }
 0x2e6   :  { %v1113_v60 = vadd.f32 %v1112_v28, %v4107_v63  ;;  %v4110_v0 = vpop.f32.mrb[49].mxu1 }
 0x2e7   :  { %v1116_v30 = vpop.f32.mrb[50].mxu1 }
 0x2e8   :  { %v1191_v35 = vmax.f32 %v1113_v60, 0.0  ;;  %v1117_v1 = vadd.f32 %v1116_v30, %v4107_v63  ;;  %v4113_v32 = vpop.f32.mrb[51].mxu1 }
 0x2ea   :  { %v1192_v33 = vmax.f32 %v1117_v1, 0.0 }
 0x2ec   :  { %v1224_v34 = vpack.c.bf16 %v1192_v33, %v1191_v35 }
 0x2ed   :  { %v1122_v36 = vpop.f32.mrb[52].mxu1 }
 0x2ee   :  { %v1123_v41 = vadd.f32 %v1122_v36, %v4107_v63  ;;  %v4116_v37 = vpop.f32.mrb[53].mxu1  ;;  %1405 = vmatprep.mubr.bf16.mxu0 %v1224_v34 }
 0x2ef   :  { %v1126_v25 = vpop.f32.mrb[54].mxu1  ;;  %1406 = vmatmul.mubr.bf16.vlgmr.msra.gmra.mrb[32].mxu0 %v3740_v16 }
 0x2f0   :  { %v1127_v2 = vadd.f32 %v1126_v25, %v4107_v63  ;;  %v4120_v38 = vpop.f32.mrb[55].mxu1  ;;  %v1193_v39 = vmax.f32 %v1123_v41, 0.0 }
 0x2f2   :  { %v1194_v29 = vmax.f32 %v1127_v2, 0.0 }
 0x2f4   :  { %v1226_v40 = vpack.c.bf16 %v1194_v29, %v1193_v39 }
 0x2f5   :  { %v1132_v43 = vpop.f32.mrb[56].mxu1 }
 0x2f6   :  { %v1133_v44 = vadd.f32 %v1132_v43, %v4107_v63  ;;  %v4123_v46 = vpop.f32.mrb[57].mxu1  ;;  %1413 = vmatprep.mubr.bf16.mxu0 %v1226_v40  ;;  %v3568_v43 = vld [vmem:[#allocation2 + $0x1c0] ss:$8 sps:$4 sm:$0xff]  }
 0x2f7   :  { %v1136_v4 = vpop.f32.mrb[58].mxu1  ;;  %1414 = vmatmul.mubr.bf16.gmra.mrb[36].mxu0 %v1224_v34 }
 0x2f8   :  { %v1137_v47 = vadd.f32 %v1136_v4, %v4107_v63  ;;  %v4126_v51 = vpop.f32.mrb[59].mxu1  ;;  %v1195_v48 = vmax.f32 %v1133_v44, 0.0  ;;  %v3573_v44 = vld [vmem:[#allocation2 + $0x1d4] ss:$8 sps:$4 sm:$0xff]   ;;  %v3571_v4 = vld [vmem:[#allocation2 + $0x1d0] ss:$8 sps:$4 sm:$0xff]  }
 0x2fa   :  { %v1196_v50 = vmax.f32 %v1137_v47, 0.0  ;;  %v3576_v47 = vld [vmem:[#allocation2 + $0x1e4] ss:$8 sps:$4 sm:$0xff]  }
 0x2fc   :  { %v1228_v57 = vpack.c.bf16 %v1196_v50, %v1195_v48  ;;  %v3574_v48 = vld [vmem:[#allocation2 + $0x1e0] ss:$8 sps:$4 sm:$0xff]   ;;  %v3577_v50 = vld [vmem:[#allocation2 + $0x1f0] ss:$8 sps:$4 sm:$0xff]  }
 0x2fd   :  { %v1142_v45 = vpop.f32.mrb[60].mxu1 }
 0x2fe   :  { %v1143_v6 = vadd.f32 %v1142_v45, %v4107_v63  ;;  %v4129_v59 = vpop.f32.mrb[61].mxu1  ;;  %1421 = vmatprep.mubr.bf16.mxu0 %v1228_v57  ;;  %v3581_v45 = vld [vmem:[#allocation5 + $0x100] sm:$0xff]  }
 0x2ff   :  { %v1146_v5 = vpop.f32.mrb[62].mxu1  ;;  %1422 = vmatmul.mubr.bf16.gmra.mrb[40].mxu0 %v1226_v40  ;;  %v3570_v40 = vld [vmem:[#allocation2 + $0x1c4] ss:$8 sps:$4 sm:$0xff]  }
 0x300   :  { %v1147_v52 = vadd.f32 %v1146_v5, %v4107_v63  ;;  %v4132_v53 = vpop.f32.mrb[63].mxu1  ;;  %v1197_v54 = vmax.f32 %v1143_v6, 0.0  ;;  %1796 = vmatprep.subr.bf16.mxu1 %v3570_v40  ;;  %v3582_v6 = vld [vmem:[#allocation5 + $0x148] sm:$0xff]  }
 0x301   :  { %1797 = vmatpush1.bf16.msra.mxu1 %v3568_v43  ;;  %v3583_v5 = vld [vmem:[#allocation5 + $0x108] sm:$0xff]  }
 0x302   :  { %v1198_v55 = vmax.f32 %v1147_v52, 0.0  ;;  %1798 = vmatprep.subr.bf16.mxu1 %v3573_v44  ;;  %v3584_v52 = vld [vmem:[#allocation5 + $0x150] sm:$0xff]  }
 0x304   :  { %v1230_v8 = vpack.c.bf16 %v1198_v55, %v1197_v54  ;;  %v3585_v54 = vld [vmem:[#allocation5 + $0x110] sm:$0xff]   ;;  %v3586_v55 = vld [vmem:[#allocation5 + $0x158] sm:$0xff]  }
 0x305   :  { %1799 = vmatpush1.bf16.msra.mxu1 %v3571_v4 }
 0x306   :  { %1429 = vmatprep.mubr.bf16.mxu0 %v1230_v8  ;;  %1800 = vmatprep.subr.bf16.mxu1 %v3576_v47 }
 0x307   :  { %v1152_v61 = vpop.f32.mrb[64].mxu1  ;;  %1430 = vmatmul.mubr.bf16.gmra.mrb[44].mxu0 %v1228_v57  ;;  %v3580_v57 = vld [vmem:[#allocation5 + $0x140] sm:$0xff]  }
 0x308   :  { %v1153_v42 = vadd.f32 %v1152_v61, %v4107_v63  ;;  %v4135_v58 = vpop.f32.mrb[65].mxu1  ;;  %3266 = vmatprep.subr.bf16.mxu0 %v3580_v57  ;;  %v3588_v61 = vld [vmem:[#allocation5 + $0x160] sm:$0xff]  }
 0x309   :  { %v1156_v56 = vpop.f32.mrb[66].mxu1  ;;  %1801 = vmatpush1.bf16.msra.mxu1 %v3574_v48  ;;  %3267 = vmatpush3.bf16.msra.mxu0 %v3581_v45 }
 0x30a   :  { %v1157_v3 = vadd.f32 %v1156_v56, %v4107_v63  ;;  %v4138_v10 = vpop.f32.mrb[67].mxu1  ;;  %v1199_v7 = vmax.f32 %v1153_v42, 0.0  ;;  %3268 = vmatprep.subr.bf16.mxu0 %v3582_v6  ;;  %v3589_v42 = vld [vmem:[#allocation5 + $0x120] sm:$0xff]   ;;  %v3590_v56 = vld [vmem:[#allocation5 + $0x168] sm:$0xff]  }
 0x30c   :  { %v1200_v24 = vmax.f32 %v1157_v3, 0.0  ;;  %v3591_v3 = vld [vmem:[#allocation5 + $0x128] sm:$0xff]  }
 0x30d   :  { %3269 = vmatpush3.bf16.msra.mxu0 %v3583_v5 }
 0x30e   :  { %v1232_v12 = vpack.c.bf16 %v1200_v24, %v1199_v7  ;;  %3270 = vmatprep.subr.bf16.mxu0 %v3584_v52  ;;  %v3592_v7 = vld [vmem:[#allocation5 + $0x170] sm:$0xff]  }
 0x30f   :  { %v1162_v31 = vpop.f32.mrb[68].mxu1  ;;  %v3593_v24 = vld [vmem:[#allocation5 + $0x130] sm:$0xff]  }
 0x310   :  { %v1163_v13 = vadd.f32 %v1162_v31, %v4107_v63  ;;  %v4141_v62 = vpop.f32.mrb[69].mxu1  ;;  %1437 = vmatprep.mubr.bf16.mxu0 %v1232_v12  ;;  %v4161_v31 = vld [vmem:[%s4490_s4 + $0x5] ss:$0 sm:$0xff] }
 0x311   :  { %v1166_v18 = vpop.f32.mrb[70].mxu1  ;;  %1438 = vmatmul.mubr.bf16.gmra.mrb[48].mxu0 %v1230_v8  ;;  %v3587_v8 = vld [vmem:[#allocation5 + $0x118] sm:$0xff]  }
 0x312   :  { %v1167_v14 = vadd.f32 %v1166_v18, %v4107_v63  ;;  %v4144_v19 = vpop.f32.mrb[71].mxu1  ;;  %v1201_v21 = vmax.f32 %v1163_v13, 0.0  ;;  %3271 = vmatpush3.bf16.msra.mxu0 %v3585_v54  ;;  %v4165_v18 = vrot.slane %v4103_v49, %v3965_v11 }
 0x313   :  { %3272 = vmatprep.subr.bf16.mxu0 %v3586_v55 }
 0x314   :  { %v1202_v20 = vmax.f32 %v1167_v14, 0.0  ;;  %v1129_v47 = vadd.f32 %v4120_v38, %v4165_v18 }
 0x316   :  { %v1234_v22 = vpack.c.bf16 %v1202_v20, %v1201_v21  ;;  %3273 = vmatpush3.bf16.msra.mxu0 %v3587_v8 }
 0x317   :  { %v1172_v26 = vpop.f32.mrb[72].mxu1  ;;  %3274 = vmatprep.subr.bf16.mxu0 %v3588_v61  ;;  %v1135_v61 = vadd.f32 %v4123_v46, %v4165_v18 }
 0x318   :  { %v1173_v23 = vadd.f32 %v1172_v26, %v4107_v63  ;;  %v4147_v15 = vpop.f32.mrb[73].mxu1  ;;  %1445 = vmatprep.mubr.bf16.mxu0 %v1234_v22 }
 0x319   :  { %v1176_v17 = vpop.f32.mrb[74].mxu1  ;;  %1446 = vmatmul.mubr.bf16.gmra.mrb[52].mxu0 %v1232_v12 }
 0x31a   :  { %v1177_v27 = vadd.f32 %v1176_v17, %v4107_v63  ;;  %v4150_v28 = vpop.f32.mrb[75].mxu1  ;;  %v1203_v60 = vmax.f32 %v1173_v23, 0.0  ;;  %3275 = vmatpush3.bf16.msra.mxu0 %v3589_v42  ;;  %v1115_v23 = vadd.f32 %v4110_v0, %v4165_v18  ;;  %v1125_v0 = vadd.f32 %v4116_v37, %v4165_v18 }
 0x31b   :  { %3276 = vmatprep.subr.bf16.mxu0 %v3590_v56 }
 0x31c   :  { %v1204_v30 = vmax.f32 %v1177_v27, 0.0 }
 0x31e   :  { %v1236_v35 = vpack.c.bf16 %v1204_v30, %v1203_v60  ;;  %3277 = vmatpush3.bf16.msra.mxu0 %v3591_v3  ;;  %v1119_v60 = vadd.f32 %v4113_v32, %v4165_v18  ;;  %v1139_v3 = vadd.f32 %v4126_v51, %v4165_v18 }
 0x31f   :  { %v1182_v1 = vpop.f32.mrb[76].mxu1  ;;  %3278 = vmatprep.subr.bf16.mxu0 %v3592_v7 }
 0x320   :  { %v1183_v33 = vadd.f32 %v1182_v1, %v4107_v63  ;;  %v4153_v34 = vpop.f32.mrb[77].mxu1  ;;  %1453 = vmatprep.mubr.bf16.mxu0 %v1236_v35 }
 0x321   :  { %v1186_v36 = vpop.f32.mrb[78].mxu1  ;;  %1454 = vmatmul.mubr.bf16.gmra.mrb[56].mxu0 %v1234_v22 }
 0x322   :  { %v1187_v41 = vadd.f32 %v1186_v36, %v4107_v63  ;;  %v4156_v25 = vpop.f32.mrb[79].mxu1  ;;  %v1205_v2 = vmax.f32 %v1183_v33, 0.0  ;;  %v3579_v63 = vld [vmem:[#allocation2 + $0x1f4] ss:$8 sps:$4 sm:$0xff]   ;;  %3279 = vmatpush3.bf16.msra.mxu0 %v3593_v24 }
 0x323   :  { %1802 = vmatprep.subr.bf16.mxu1 %v3579_v63 }
 0x324   :  { %v1206_v39 = vmax.f32 %v1187_v41, 0.0  ;;  %1803 = vmatpush1.bf16.msra.mxu1 %v3577_v50 }
 0x326   :  { %v1238_v29 = vpack.c.bf16 %v1206_v39, %v1205_v2 }
 0x328   :  { %1461 = vmatprep.mubr.bf16.mxu0 %v1238_v29 }
 0x329   :  { %1462 = vmatmul.mubr.bf16.gmra.mrb[60].mxu0 %v1236_v35 }
 0x3c2   :  { %v3218_v12 = vpop.f32.mrb[32].mxu0 }
 0x3c3   :  { %v3219_v13 = vpop.f32.mrb[33].mxu0 }
 0x3c4   :  { %v3220_v14 = vadd.f32 %v3219_v13, %v3218_v12  ;;  %v3221_v21 = vpop.f32.mrb[34].mxu0 }
 0x3c5   :  { %v3222_v20 = vpop.f32.mrb[35].mxu0 }
 0x3c6   :  { %v1408_v22 = vadd.f32 %v3220_v14, %v4161_v31  ;;  %v3223_v26 = vadd.f32 %v3222_v20, %v3221_v21 }
 0x3c8   :  { %v1470_v17 = vmax.f32 %v1408_v22, 0.0  ;;  %v1411_v27 = vadd.f32 %v3223_v26, %v4161_v31 }
 0x3ca   :  { %v1486_v30 = vadd.f32 %v1470_v17, %v1115_v23  ;;  %v1471_v35 = vmax.f32 %v1411_v27, 0.0  ;;  %v3224_v1 = vpop.f32.mrb[36].mxu0  ;;  %v1145_v27 = vadd.f32 %v4129_v59, %v4165_v18 }
 0x3cb   :  { %v3225_v49 = vpop.f32.mrb[37].mxu0 }
 0x3cc   :  { %v1487_v33 = vadd.f32 %v1471_v35, %v1119_v60  ;;  %v3226_v36 = vadd.f32 %v3225_v49, %v3224_v1  ;;  %v3227_v41 = vpop.f32.mrb[38].mxu0  ;;  %v1502_v39 = vmax.f32 %v1486_v30, 0.0  ;;  %v1149_v35 = vadd.f32 %v4132_v53, %v4165_v18 }
 0x3cd   :  { %v3228_v2 = vpop.f32.mrb[39].mxu0 }
 0x3ce   :  { %v1503_v29 = vmax.f32 %v1487_v33, 0.0  ;;  %v1416_v40 = vadd.f32 %v3226_v36, %v4161_v31  ;;  %v3229_v43 = vadd.f32 %v3228_v2, %v3227_v41 }
 0x3d0   :  { %v1472_v44 = vmax.f32 %v1416_v40, 0.0  ;;  %v1419_v4 = vadd.f32 %v3229_v43, %v4161_v31  ;;  %v1551_v32 = vpack.c.bf16 %v1503_v29, %v1502_v39 }
 0x3d2   :  { %v1488_v48 = vadd.f32 %v1472_v44, %v1125_v0  ;;  %v1473_v63 = vmax.f32 %v1419_v4, 0.0  ;;  %v3230_v50 = vpop.f32.mrb[40].mxu0  ;;  %1804 = vmatprep.mubr.bf16.mxu1 %v1551_v32  ;;  %v1155_v4 = vadd.f32 %v4135_v58, %v4165_v18 }
 0x3d3   :  { %v3231_v57 = vpop.f32.mrb[41].mxu0  ;;  %1805 = vmatmul.mubr.bf16.vlgmr.msra.gmra.mrb[80].mxu1 %v3740_v16 }
 0x3d4   :  { %v1489_v45 = vadd.f32 %v1473_v63, %v1129_v47  ;;  %v3232_v6 = vadd.f32 %v3231_v57, %v3230_v50  ;;  %v3233_v5 = vpop.f32.mrb[42].mxu0  ;;  %v1504_v54 = vmax.f32 %v1488_v48, 0.0 }
 0x3d5   :  { %v3234_v52 = vpop.f32.mrb[43].mxu0 }
 0x3d6   :  { %v1505_v37 = vmax.f32 %v1489_v45, 0.0  ;;  %v1424_v55 = vadd.f32 %v3232_v6, %v4161_v31  ;;  %v3235_v8 = vadd.f32 %v3234_v52, %v3233_v5 }
 0x3d8   :  { %v1474_v38 = vmax.f32 %v1424_v55, 0.0  ;;  %v1427_v42 = vadd.f32 %v3235_v8, %v4161_v31  ;;  %v1553_v56 = vpack.c.bf16 %v1505_v37, %v1504_v54  ;;  %v1165_v8 = vadd.f32 %v4141_v62, %v4165_v18 }
 0x3da   :  { %v1490_v7 = vadd.f32 %v1474_v38, %v1135_v61  ;;  %v1475_v24 = vmax.f32 %v1427_v42, 0.0  ;;  %v3236_v12 = vpop.f32.mrb[44].mxu0  ;;  %1814 = vmatprep.mubr.bf16.mxu1 %v1553_v56  ;;  %v1169_v42 = vadd.f32 %v4144_v19, %v4165_v18 }
 0x3db   :  { %v3237_v13 = vpop.f32.mrb[45].mxu0  ;;  %1815 = vmatmul.mubr.bf16.gmra.mrb[84].mxu1 %v3740_v16 }
 0x3dc   :  { %v1491_v14 = vadd.f32 %v1475_v24, %v1139_v3  ;;  %v3238_v21 = vadd.f32 %v3237_v13, %v3236_v12  ;;  %v3239_v20 = vpop.f32.mrb[46].mxu0  ;;  %v1506_v26 = vmax.f32 %v1490_v7, 0.0 }
 0x3dd   :  { %v3240_v22 = vpop.f32.mrb[47].mxu0 }
 0x3de   :  { %v1507_v46 = vmax.f32 %v1491_v14, 0.0  ;;  %v1432_v23 = vadd.f32 %v3238_v21, %v4161_v31  ;;  %v3241_v17 = vadd.f32 %v3240_v22, %v3239_v20 }
 0x3e0   :  { %v1476_v51 = vmax.f32 %v1432_v23, 0.0  ;;  %v1435_v60 = vadd.f32 %v3241_v17, %v4161_v31  ;;  %v1555_v30 = vpack.c.bf16 %v1507_v46, %v1506_v26  ;;  %v1175_v46 = vadd.f32 %v4147_v15, %v4165_v18 }
 0x3e2   :  { %v1492_v1 = vadd.f32 %v1476_v51, %v1145_v27  ;;  %v1477_v49 = vmax.f32 %v1435_v60, 0.0  ;;  %1824 = vmatprep.mubr.bf16.mxu1 %v1555_v30  ;;  %v1179_v27 = vadd.f32 %v4150_v28, %v4165_v18 }
 0x3e3   :  { %1825 = vmatmul.mubr.bf16.gmra.mrb[88].mxu1 %v1551_v32  ;;  %v1159_v32 = vadd.f32 %v4138_v10, %v4165_v18 }
 0x3e4   :  { %v1493_v33 = vadd.f32 %v1477_v49, %v1149_v35  ;;  %v3242_v36 = vpop.f32.mrb[48].mxu0  ;;  %v1508_v2 = vmax.f32 %v1492_v1, 0.0 }
 0x3e5   :  { %v3243_v41 = vpop.f32.mrb[49].mxu0 }
 0x3e6   :  { %v1509_v39 = vmax.f32 %v1493_v33, 0.0  ;;  %v3244_v29 = vadd.f32 %v3243_v41, %v3242_v36  ;;  %v3245_v40 = vpop.f32.mrb[50].mxu0 }
 0x3e7   :  { %v3246_v43 = vpop.f32.mrb[51].mxu0 }
 0x3e8   :  { %v1440_v59 = vadd.f32 %v3244_v29, %v4161_v31  ;;  %v3247_v0 = vadd.f32 %v3246_v43, %v3245_v40  ;;  %v1557_v44 = vpack.c.bf16 %v1509_v39, %v1508_v2  ;;  %v1185_v29 = vadd.f32 %v4153_v34, %v4165_v18  ;;  %v3596_v34 = vld [vmem:[#allocation2 + $0x200] ss:$8 sps:$4 sm:$0xff]  }
 0x3ea   :  { %v1478_v53 = vmax.f32 %v1440_v59, 0.0  ;;  %v1443_v47 = vadd.f32 %v3247_v0, %v4161_v31  ;;  %1834 = vmatprep.mubr.bf16.mxu1 %v1557_v44  ;;  %v1189_v59 = vadd.f32 %v4156_v25, %v4165_v18  ;;  %v3599_v25 = vld [vmem:[#allocation2 + $0x210] ss:$8 sps:$4 sm:$0xff]   ;;  %v3604_v18 = vld [vmem:[#allocation2 + $0x224] ss:$8 sps:$4 sm:$0xff]  }
 0x3eb   :  { %1835 = vmatmul.mubr.bf16.gmra.mrb[92].mxu1 %v1553_v56 }
 0x3ec   :  { %v1494_v48 = vadd.f32 %v1478_v53, %v1155_v4  ;;  %v1479_v63 = vmax.f32 %v1443_v47, 0.0  ;;  %v3248_v50 = vpop.f32.mrb[52].mxu0 }
 0x3ed   :  { %v3249_v57 = vpop.f32.mrb[53].mxu0 }
 0x3ee   :  { %v1495_v45 = vadd.f32 %v1479_v63, %v1159_v32  ;;  %v3250_v6 = vadd.f32 %v3249_v57, %v3248_v50  ;;  %v3251_v5 = vpop.f32.mrb[54].mxu0  ;;  %v1510_v54 = vmax.f32 %v1494_v48, 0.0  ;;  %v3594_v48 = vld [vmem:[#allocation5 + $0x178] sm:$0xff]   ;;  %v3602_v57 = vld [vmem:[#allocation2 + $0x220] ss:$8 sps:$4 sm:$0xff]  }
 0x3ef   :  { %v3252_v52 = vpop.f32.mrb[55].mxu0  ;;  %v3595_v63 = vld [vmem:[#allocation5 + $0x138] sm:$0xff]   ;;  %3280 = vmatprep.subr.bf16.mxu0 %v3594_v48 }
 0x3f0   :  { %v1511_v37 = vmax.f32 %v1495_v45, 0.0  ;;  %v1448_v58 = vadd.f32 %v3250_v6, %v4161_v31  ;;  %v3253_v55 = vadd.f32 %v3252_v52, %v3251_v5  ;;  %3281 = vmatpush3.bf16.msra.mxu0 %v3595_v63  ;;  %v3601_v50 = vld [vmem:[#allocation2 + $0x214] ss:$8 sps:$4 sm:$0xff]   ;;  %v3605_v6 = vld [vmem:[#allocation2 + $0x230] ss:$8 sps:$4 sm:$0xff]  }
 0x3f1   :  { %v3607_v45 = vld [vmem:[#allocation2 + $0x234] ss:$8 sps:$4 sm:$0xff]   ;;  %v3610_v5 = vld [vmem:[#allocation2 + $0x244] ss:$8 sps:$4 sm:$0xff]   ;;  %v3608_v52 = vld [vmem:[#allocation2 + $0x240] ss:$8 sps:$4 sm:$0xff]  }
 0x3f2   :  { %v1480_v61 = vmax.f32 %v1448_v58, 0.0  ;;  %v1451_v38 = vadd.f32 %v3253_v55, %v4161_v31  ;;  %v1559_v10 = vpack.c.bf16 %v1511_v37, %v1510_v54  ;;  %v3613_v54 = vld [vmem:[#allocation2 + $0x254] ss:$8 sps:$4 sm:$0xff]   ;;  %v3611_v37 = vld [vmem:[#allocation2 + $0x250] ss:$8 sps:$4 sm:$0xff]  }
 0x3f3   :  { %v3616_v58 = vld [vmem:[#allocation2 + $0x264] ss:$8 sps:$4 sm:$0xff]   ;;  %v3614_v55 = vld [vmem:[#allocation2 + $0x260] ss:$8 sps:$4 sm:$0xff]  }
 0x3f4   :  { %v1496_v56 = vadd.f32 %v1480_v61, %v1165_v8  ;;  %v1481_v3 = vmax.f32 %v1451_v38, 0.0  ;;  %v3254_v7 = vpop.f32.mrb[56].mxu0  ;;  %1844 = vmatprep.mubr.bf16.mxu1 %v1559_v10  ;;  %v3619_v8 = vld [vmem:[#allocation2 + $0x274] ss:$8 sps:$4 sm:$0xff]   ;;  %v3617_v61 = vld [vmem:[#allocation2 + $0x270] ss:$8 sps:$4 sm:$0xff]  }
 0x3f5   :  { %v3255_v24 = vpop.f32.mrb[57].mxu0  ;;  %1845 = vmatmul.mubr.bf16.gmra.mrb[96].mxu1 %v1555_v30  ;;  %v3622_v38 = vld [vmem:[#allocation2 + $0x284] ss:$8 sps:$4 sm:$0xff]  }
 0x3f6   :  { %v1497_v12 = vadd.f32 %v1481_v3, %v1169_v42  ;;  %v3256_v13 = vadd.f32 %v3255_v24, %v3254_v7  ;;  %v3257_v14 = vpop.f32.mrb[58].mxu0  ;;  %v1512_v20 = vmax.f32 %v1496_v56, 0.0  ;;  %v3625_v42 = vld [vmem:[#allocation2 + $0x294] ss:$8 sps:$4 sm:$0xff]   ;;  %v3623_v56 = vld [vmem:[#allocation2 + $0x290] ss:$8 sps:$4 sm:$0xff]  }
 0x3f7   :  { %v3258_v21 = vpop.f32.mrb[59].mxu0  ;;  %v3628_v3 = vld [vmem:[#allocation2 + $0x2a4] ss:$8 sps:$4 sm:$0xff]   ;;  %v3626_v7 = vld [vmem:[#allocation2 + $0x2a0] ss:$8 sps:$4 sm:$0xff]  }
 0x3f8   :  { %v1513_v22 = vmax.f32 %v1497_v12, 0.0  ;;  %v1456_v62 = vadd.f32 %v3256_v13, %v4161_v31  ;;  %v3259_v26 = vadd.f32 %v3258_v21, %v3257_v14  ;;  %v3631_v24 = vld [vmem:[#allocation2 + $0x2b4] ss:$8 sps:$4 sm:$0xff]   ;;  %v3629_v12 = vld [vmem:[#allocation2 + $0x2b0] ss:$8 sps:$4 sm:$0xff]  }
 0x3f9   :  { %v4220_v13 = vld [vmem:[%s4490_s4 + $0x8] ss:$2 sm:$0x3] }
 0x3fa   :  { %v1482_v23 = vmax.f32 %v1456_v62, 0.0  ;;  %v1459_v19 = vadd.f32 %v3259_v26, %v4161_v31  ;;  %v1561_v17 = vpack.c.bf16 %v1513_v22, %v1512_v20  ;;  %v4224_v14 = vrot.slane %v4220_v13, %v3960_v9 }
 0x3fc   :  { %v1498_v51 = vadd.f32 %v1482_v23, %v1175_v46  ;;  %v1483_v60 = vmax.f32 %v1459_v19, 0.0  ;;  %v3260_v30 = vpop.f32.mrb[60].mxu0  ;;  %1854 = vmatprep.mubr.bf16.mxu1 %v1561_v17 }
 0x3fd   :  { %v3261_v35 = vpop.f32.mrb[61].mxu0  ;;  %1855 = vmatmul.mubr.bf16.gmra.mrb[100].mxu1 %v1557_v44 }
 0x3fe   :  { %v1499_v1 = vadd.f32 %v1483_v60, %v1179_v27  ;;  %v3262_v49 = vadd.f32 %v3261_v35, %v3260_v30  ;;  %v3263_v33 = vpop.f32.mrb[62].mxu0  ;;  %v1514_v41 = vmax.f32 %v1498_v51, 0.0 }
 0x3ff   :  { %v3264_v36 = vpop.f32.mrb[63].mxu0 }
 0x400   :  { %v1515_v2 = vmax.f32 %v1499_v1, 0.0  ;;  %v1464_v15 = vadd.f32 %v3262_v49, %v4161_v31  ;;  %v3265_v39 = vadd.f32 %v3264_v36, %v3263_v33 }
 0x402   :  { %v1484_v40 = vmax.f32 %v1464_v15, 0.0  ;;  %v1467_v28 = vadd.f32 %v3265_v39, %v4161_v31  ;;  %v1563_v43 = vpack.c.bf16 %v1515_v2, %v1514_v41  ;;  %v3598_v31 = vld [vmem:[#allocation2 + $0x204] ss:$8 sps:$4 sm:$0xff]  }
 0x403   :  { %2466 = vmatprep.subr.bf16.mxu1 %v3598_v31 }
 0x404   :  { %v1500_v0 = vadd.f32 %v1484_v40, %v1185_v29  ;;  %v1485_v44 = vmax.f32 %v1467_v28, 0.0  ;;  %1864 = vmatprep.mubr.bf16.mxu1 %v1563_v43  ;;  %2467 = vmatpush1.bf16.msra.mxu1 %v3596_v34 }
 0x405   :  { %1865 = vmatmul.mubr.bf16.gmra.mrb[104].mxu1 %v1559_v10  ;;  %2468 = vmatprep.subr.bf16.mxu1 %v3601_v50  ;;  %v3620_v10 = vld [vmem:[#allocation2 + $0x280] ss:$8 sps:$4 sm:$0xff]  }
 0x406   :  { %v1501_v4 = vadd.f32 %v1485_v44, %v1189_v59  ;;  %v1516_v53 = vmax.f32 %v1500_v0, 0.0 }
 0x408   :  { %v1517_v47 = vmax.f32 %v1501_v4, 0.0  ;;  %2469 = vmatpush1.bf16.msra.mxu1 %v3599_v25 }
 0x409   :  { %2470 = vmatprep.subr.bf16.mxu1 %v3604_v18 }
 0x40a   :  { %v1565_v32 = vpack.c.bf16 %v1517_v47, %v1516_v53 }
 0x40c   :  { %1874 = vmatprep.mubr.bf16.mxu1 %v1565_v32  ;;  %2471 = vmatpush1.bf16.msra.mxu1 %v3602_v57 }
 0x40d   :  { %1875 = vmatmul.mubr.bf16.gmra.mrb[108].mxu1 %v1561_v17  ;;  %2472 = vmatprep.subr.bf16.mxu1 %v3607_v45 }
 0x410   :  { %2473 = vmatpush1.bf16.msra.mxu1 %v3605_v6 }
 0x411   :  { %2474 = vmatprep.subr.bf16.mxu1 %v3610_v5 }
 0x414   :  { %2475 = vmatpush1.bf16.msra.mxu1 %v3608_v52 }
 0x415   :  { %2476 = vmatprep.subr.bf16.mxu1 %v3613_v54 }
 0x418   :  { %2477 = vmatpush1.bf16.msra.mxu1 %v3611_v37 }
 0x419   :  { %2478 = vmatprep.subr.bf16.mxu1 %v3616_v58 }
 0x41c   :  { %2479 = vmatpush1.bf16.msra.mxu1 %v3614_v55 }
 0x41d   :  { %2480 = vmatprep.subr.bf16.mxu1 %v3619_v8 }
 0x420   :  { %2481 = vmatpush1.bf16.msra.mxu1 %v3617_v61 }
 0x421   :  { %2482 = vmatprep.subr.bf16.mxu1 %v3622_v38 }
 0x424   :  { %2483 = vmatpush1.bf16.msra.mxu1 %v3620_v10 }
 0x425   :  { %2484 = vmatprep.subr.bf16.mxu1 %v3625_v42 }
 0x428   :  { %2485 = vmatpush1.bf16.msra.mxu1 %v3623_v56 }
 0x429   :  { %2486 = vmatprep.subr.bf16.mxu1 %v3628_v3 }
 0x42c   :  { %2487 = vmatpush1.bf16.msra.mxu1 %v3626_v7 }
 0x42d   :  { %2488 = vmatprep.subr.bf16.mxu1 %v3631_v24 }
 0x430   :  { %2489 = vmatpush1.bf16.msra.mxu1 %v3629_v12 }
 0x4a6   :  { %v1806_v21 = vpop.f32.mrb[80].mxu1 }
 0x4a7   :  { %v1807_v20 = vadd.f32 %v1806_v21, %v4224_v14  ;;  %v4227_v22 = vpop.f32.mrb[81].mxu1 }
 0x4a8   :  { %v1810_v62 = vpop.f32.mrb[82].mxu1 }
 0x4a9   :  { %v1885_v26 = vmax.f32 %v1807_v20, 0.0  ;;  %v1811_v46 = vadd.f32 %v1810_v62, %v4224_v14  ;;  %v4230_v23 = vpop.f32.mrb[83].mxu1 }
 0x4ab   :  { %v1886_v19 = vmax.f32 %v1811_v46, 0.0 }
 0x4ad   :  { %v1918_v17 = vpack.c.bf16 %v1886_v19, %v1885_v26 }
 0x4ae   :  { %v1816_v27 = vpop.f32.mrb[84].mxu1 }
 0x4af   :  { %v1817_v51 = vadd.f32 %v1816_v27, %v4224_v14  ;;  %v4233_v60 = vpop.f32.mrb[85].mxu1  ;;  %2099 = vmatprep.mubr.bf16.mxu0 %v1918_v17 }
 0x4b0   :  { %v1820_v30 = vpop.f32.mrb[86].mxu1  ;;  %2100 = vmatmul.mubr.bf16.vlgmr.msra.gmra.mrb[64].mxu0 %v3740_v16 }
 0x4b1   :  { %v1887_v35 = vmax.f32 %v1817_v51, 0.0  ;;  %v1821_v1 = vadd.f32 %v1820_v30, %v4224_v14  ;;  %v4237_v49 = vpop.f32.mrb[87].mxu1 }
 0x4b3   :  { %v1888_v33 = vmax.f32 %v1821_v1, 0.0 }
 0x4b5   :  { %v1920_v36 = vpack.c.bf16 %v1888_v33, %v1887_v35 }
 0x4b6   :  { %v1826_v41 = vpop.f32.mrb[88].mxu1 }
 0x4b7   :  { %v1827_v2 = vadd.f32 %v1826_v41, %v4224_v14  ;;  %v4240_v15 = vpop.f32.mrb[89].mxu1  ;;  %2107 = vmatprep.mubr.bf16.mxu0 %v1920_v36  ;;  %v3632_v41 = vld [vmem:[#allocation2 + $0x2c0] ss:$8 sps:$4 sm:$0xff]  }
 0x4b8   :  { %v1830_v39 = vpop.f32.mrb[90].mxu1  ;;  %2108 = vmatmul.mubr.bf16.gmra.mrb[68].mxu0 %v3740_v16 }
 0x4b9   :  { %v1831_v29 = vadd.f32 %v1830_v39, %v4224_v14  ;;  %v4244_v40 = vpop.f32.mrb[91].mxu1  ;;  %v1889_v28 = vmax.f32 %v1827_v2, 0.0  ;;  %v3637_v2 = vld [vmem:[#allocation2 + $0x2d4] ss:$8 sps:$4 sm:$0xff]   ;;  %v3635_v39 = vld [vmem:[#allocation2 + $0x2d0] ss:$8 sps:$4 sm:$0xff]  }
 0x4bb   :  { %v1890_v43 = vmax.f32 %v1831_v29, 0.0  ;;  %v3640_v29 = vld [vmem:[#allocation2 + $0x2e4] ss:$8 sps:$4 sm:$0xff]  }
 0x4bd   :  { %v1922_v59 = vpack.c.bf16 %v1890_v43, %v1889_v28  ;;  %v3638_v28 = vld [vmem:[#allocation2 + $0x2e0] ss:$8 sps:$4 sm:$0xff]   ;;  %v3641_v43 = vld [vmem:[#allocation2 + $0x2f0] ss:$8 sps:$4 sm:$0xff]  }
 0x4be   :  { %v1836_v0 = vpop.f32.mrb[92].mxu1 }
 0x4bf   :  { %v1837_v44 = vadd.f32 %v1836_v0, %v4224_v14  ;;  %v4247_v4 = vpop.f32.mrb[93].mxu1  ;;  %2115 = vmatprep.mubr.bf16.mxu0 %v1922_v59  ;;  %v3645_v0 = vld [vmem:[#allocation5 + $0x180] sm:$0xff]  }
 0x4c0   :  { %v1840_v53 = vpop.f32.mrb[94].mxu1  ;;  %2116 = vmatmul.mubr.bf16.gmra.mrb[72].mxu0 %v1918_v17 }
 0x4c1   :  { %v1841_v47 = vadd.f32 %v1840_v53, %v4224_v14  ;;  %v4250_v32 = vpop.f32.mrb[95].mxu1  ;;  %v1891_v48 = vmax.f32 %v1837_v44, 0.0  ;;  %v3646_v44 = vld [vmem:[#allocation5 + $0x1c8] sm:$0xff]  }
 0x4c2   :  { %v3647_v53 = vld [vmem:[#allocation5 + $0x188] sm:$0xff]  }
 0x4c3   :  { %v1892_v63 = vmax.f32 %v1841_v47, 0.0  ;;  %v3648_v47 = vld [vmem:[#allocation5 + $0x1d0] sm:$0xff]  }
 0x4c5   :  { %v1924_v34 = vpack.c.bf16 %v1892_v63, %v1891_v48  ;;  %v3649_v48 = vld [vmem:[#allocation5 + $0x190] sm:$0xff]   ;;  %v3650_v63 = vld [vmem:[#allocation5 + $0x1d8] sm:$0xff]  }
 0x4c7   :  { %2123 = vmatprep.mubr.bf16.mxu0 %v1924_v34 }
 0x4c8   :  { %v1846_v31 = vpop.f32.mrb[96].mxu1  ;;  %2124 = vmatmul.mubr.bf16.gmra.mrb[76].mxu0 %v1920_v36  ;;  %v3634_v36 = vld [vmem:[#allocation2 + $0x2c4] ss:$8 sps:$4 sm:$0xff]  }
 0x4c9   :  { %v1847_v50 = vadd.f32 %v1846_v31, %v4224_v14  ;;  %v4253_v25 = vpop.f32.mrb[97].mxu1  ;;  %2490 = vmatprep.subr.bf16.mxu1 %v3634_v36  ;;  %v3652_v31 = vld [vmem:[#allocation5 + $0x1e0] sm:$0xff]  }
 0x4ca   :  { %v1850_v18 = vpop.f32.mrb[98].mxu1  ;;  %2491 = vmatpush1.bf16.msra.mxu1 %v3632_v41 }
 0x4cb   :  { %v1851_v57 = vadd.f32 %v1850_v18, %v4224_v14  ;;  %v4256_v45 = vpop.f32.mrb[99].mxu1  ;;  %v1893_v6 = vmax.f32 %v1847_v50, 0.0  ;;  %2492 = vmatprep.subr.bf16.mxu1 %v3637_v2  ;;  %v3653_v50 = vld [vmem:[#allocation5 + $0x1a0] sm:$0xff]   ;;  %v3654_v18 = vld [vmem:[#allocation5 + $0x1e8] sm:$0xff]  }
 0x4cd   :  { %v1894_v5 = vmax.f32 %v1851_v57, 0.0  ;;  %v3655_v57 = vld [vmem:[#allocation5 + $0x1a8] sm:$0xff]  }
 0x4ce   :  { %2493 = vmatpush1.bf16.msra.mxu1 %v3635_v39 }
 0x4cf   :  { %v1926_v52 = vpack.c.bf16 %v1894_v5, %v1893_v6  ;;  %2494 = vmatprep.subr.bf16.mxu1 %v3640_v29  ;;  %v3656_v6 = vld [vmem:[#allocation5 + $0x1f0] sm:$0xff]  }
 0x4d0   :  { %v1856_v54 = vpop.f32.mrb[100].mxu1  ;;  %v3657_v5 = vld [vmem:[#allocation5 + $0x1b0] sm:$0xff]  }
 0x4d1   :  { %v1857_v37 = vadd.f32 %v1856_v54, %v4224_v14  ;;  %v4259_v58 = vpop.f32.mrb[101].mxu1  ;;  %2131 = vmatprep.mubr.bf16.mxu0 %v1926_v52  ;;  %v4279_v54 = vld [vmem:[%s4490_s4 + $0x9] ss:$0 sm:$0xff] }
 0x4d2   :  { %v1860_v55 = vpop.f32.mrb[102].mxu1  ;;  %2132 = vmatmul.mubr.bf16.gmra.mrb[80].mxu0 %v1922_v59  ;;  %2495 = vmatpush1.bf16.msra.mxu1 %v3638_v28  ;;  %v3644_v59 = vld [vmem:[#allocation5 + $0x1c0] sm:$0xff]  }
 0x4d3   :  { %v1861_v8 = vadd.f32 %v1860_v55, %v4224_v14  ;;  %v4262_v61 = vpop.f32.mrb[103].mxu1  ;;  %v1895_v38 = vmax.f32 %v1857_v37, 0.0  ;;  %3330 = vmatprep.subr.bf16.mxu0 %v3644_v59  ;;  %v4283_v55 = vrot.slane %v4220_v13, %v3965_v11 }
 0x4d4   :  { %3331 = vmatpush3.bf16.msra.mxu0 %v3645_v0 }
 0x4d5   :  { %v1896_v10 = vmax.f32 %v1861_v8, 0.0  ;;  %3332 = vmatprep.subr.bf16.mxu0 %v3646_v44  ;;  %v1823_v29 = vadd.f32 %v4237_v49, %v4283_v55  ;;  %v1829_v49 = vadd.f32 %v4240_v15, %v4283_v55 }
 0x4d7   :  { %v1928_v42 = vpack.c.bf16 %v1896_v10, %v1895_v38 }
 0x4d8   :  { %v1866_v56 = vpop.f32.mrb[104].mxu1  ;;  %3333 = vmatpush3.bf16.msra.mxu0 %v3647_v53 }
 0x4d9   :  { %v1867_v3 = vadd.f32 %v1866_v56, %v4224_v14  ;;  %v4265_v7 = vpop.f32.mrb[105].mxu1  ;;  %2139 = vmatprep.mubr.bf16.mxu0 %v1928_v42  ;;  %3334 = vmatprep.subr.bf16.mxu0 %v3648_v47 }
 0x4da   :  { %v1870_v24 = vpop.f32.mrb[106].mxu1  ;;  %2140 = vmatmul.mubr.bf16.gmra.mrb[84].mxu0 %v1924_v34  ;;  %v3651_v34 = vld [vmem:[#allocation5 + $0x198] sm:$0xff]  }
 0x4db   :  { %v1871_v12 = vadd.f32 %v1870_v24, %v4224_v14  ;;  %v4268_v21 = vpop.f32.mrb[107].mxu1  ;;  %v1897_v20 = vmax.f32 %v1867_v3, 0.0  ;;  %v1809_v3 = vadd.f32 %v4227_v22, %v4283_v55  ;;  %v1819_v22 = vadd.f32 %v4233_v60, %v4283_v55 }
 0x4dc   :  { %3335 = vmatpush3.bf16.msra.mxu0 %v3649_v48 }
 0x4dd   :  { %v1898_v62 = vmax.f32 %v1871_v12, 0.0  ;;  %3336 = vmatprep.subr.bf16.mxu0 %v3650_v63 }
 0x4df   :  { %v1930_v26 = vpack.c.bf16 %v1898_v62, %v1897_v20  ;;  %v1813_v20 = vadd.f32 %v4230_v23, %v4283_v55 }
 0x4e0   :  { %v1876_v46 = vpop.f32.mrb[108].mxu1  ;;  %3337 = vmatpush3.bf16.msra.mxu0 %v3651_v34 }
 0x4e1   :  { %v1877_v19 = vadd.f32 %v1876_v46, %v4224_v14  ;;  %v4271_v17 = vpop.f32.mrb[109].mxu1  ;;  %2147 = vmatprep.mubr.bf16.mxu0 %v1930_v26  ;;  %3338 = vmatprep.subr.bf16.mxu0 %v3652_v31 }
 0x4e2   :  { %v1880_v27 = vpop.f32.mrb[110].mxu1  ;;  %2148 = vmatmul.mubr.bf16.gmra.mrb[88].mxu0 %v1926_v52 }
 0x4e3   :  { %v1881_v51 = vadd.f32 %v1880_v27, %v4224_v14  ;;  %v4274_v30 = vpop.f32.mrb[111].mxu1  ;;  %v1899_v35 = vmax.f32 %v1877_v19, 0.0  ;;  %v3643_v14 = vld [vmem:[#allocation2 + $0x2f4] ss:$8 sps:$4 sm:$0xff]  }
 0x4e4   :  { %2496 = vmatprep.subr.bf16.mxu1 %v3643_v14  ;;  %3339 = vmatpush3.bf16.msra.mxu0 %v3653_v50 }
 0x4e5   :  { %v1900_v1 = vmax.f32 %v1881_v51, 0.0  ;;  %2497 = vmatpush1.bf16.msra.mxu1 %v3641_v43  ;;  %3340 = vmatprep.subr.bf16.mxu0 %v3654_v18 }
 0x4e7   :  { %v1932_v33 = vpack.c.bf16 %v1900_v1, %v1899_v35 }
 0x4e8   :  { %3341 = vmatpush3.bf16.msra.mxu0 %v3655_v57  ;;  %v1833_v57 = vadd.f32 %v4244_v40, %v4283_v55  ;;  %v1839_v40 = vadd.f32 %v4247_v4, %v4283_v55 }
 0x4e9   :  { %2155 = vmatprep.mubr.bf16.mxu0 %v1932_v33  ;;  %3342 = vmatprep.subr.bf16.mxu0 %v3656_v6 }
 0x4ea   :  { %2156 = vmatmul.mubr.bf16.gmra.mrb[92].mxu0 %v1928_v42 }
 0x4ec   :  { %3343 = vmatpush3.bf16.msra.mxu0 %v3657_v5 }
 0x583   :  { %v3282_v52 = vpop.f32.mrb[64].mxu0 }
 0x584   :  { %v3283_v37 = vpop.f32.mrb[65].mxu0 }
 0x585   :  { %v3284_v8 = vadd.f32 %v3283_v37, %v3282_v52  ;;  %v3285_v38 = vpop.f32.mrb[66].mxu0 }
 0x586   :  { %v3286_v10 = vpop.f32.mrb[67].mxu0 }
 0x587   :  { %v2102_v42 = vadd.f32 %v3284_v8, %v4279_v54  ;;  %v3287_v56 = vadd.f32 %v3286_v10, %v3285_v38 }
 0x589   :  { %v2164_v24 = vmax.f32 %v2102_v42, 0.0  ;;  %v2105_v12 = vadd.f32 %v3287_v56, %v4279_v54 }
 0x58b   :  { %v2180_v62 = vadd.f32 %v2164_v24, %v1809_v3  ;;  %v2165_v26 = vmax.f32 %v2105_v12, 0.0  ;;  %v3288_v46 = vpop.f32.mrb[68].mxu0 }
 0x58c   :  { %v3289_v13 = vpop.f32.mrb[69].mxu0 }
 0x58d   :  { %v2181_v19 = vadd.f32 %v2165_v26, %v1813_v20  ;;  %v3290_v27 = vadd.f32 %v3289_v13, %v3288_v46  ;;  %v3291_v51 = vpop.f32.mrb[70].mxu0  ;;  %v2196_v1 = vmax.f32 %v2180_v62, 0.0  ;;  %v1843_v26 = vadd.f32 %v4250_v32, %v4283_v55 }
 0x58e   :  { %v3292_v35 = vpop.f32.mrb[71].mxu0  ;;  %v1849_v32 = vadd.f32 %v4253_v25, %v4283_v55 }
 0x58f   :  { %v2197_v33 = vmax.f32 %v2181_v19, 0.0  ;;  %v2110_v36 = vadd.f32 %v3290_v27, %v4279_v54  ;;  %v3293_v41 = vadd.f32 %v3292_v35, %v3291_v51 }
 0x591   :  { %v2166_v2 = vmax.f32 %v2110_v36, 0.0  ;;  %v2113_v39 = vadd.f32 %v3293_v41, %v4279_v54  ;;  %v4295_v23 = vpack.c.bf16 %v2197_v33, %v2196_v1 }
 0x593   :  { %v2182_v28 = vadd.f32 %v2166_v2, %v1819_v22  ;;  %v2167_v14 = vmax.f32 %v2113_v39, 0.0  ;;  %v3294_v43 = vpop.f32.mrb[72].mxu0  ;;  %2498 = vmatprep.mubr.bf16.mxu1 %v4295_v23 }
 0x594   :  { %v3295_v59 = vpop.f32.mrb[73].mxu0  ;;  %2499 = vmatmul.mubr.bf16.vlgmr.msra.gmra.mrb[112].mxu1 %v3740_v16 }
 0x595   :  { %v2183_v0 = vadd.f32 %v2167_v14, %v1823_v29  ;;  %v3296_v44 = vadd.f32 %v3295_v59, %v3294_v43  ;;  %v3297_v53 = vpop.f32.mrb[74].mxu0  ;;  %v2198_v47 = vmax.f32 %v2182_v28, 0.0  ;;  %v1853_v28 = vadd.f32 %v4256_v45, %v4283_v55 }
 0x596   :  { %v3298_v60 = vpop.f32.mrb[75].mxu0 }
 0x597   :  { %v2199_v48 = vmax.f32 %v2183_v0, 0.0  ;;  %v2118_v63 = vadd.f32 %v3296_v44, %v4279_v54  ;;  %v3299_v34 = vadd.f32 %v3298_v60, %v3297_v53 }
 0x599   :  { %v2168_v31 = vmax.f32 %v2118_v63, 0.0  ;;  %v2121_v50 = vadd.f32 %v3299_v34, %v4279_v54  ;;  %v4305_v18 = vpack.c.bf16 %v2199_v48, %v2198_v47 }
 0x59b   :  { %v2184_v6 = vadd.f32 %v2168_v31, %v1829_v49  ;;  %v2169_v5 = vmax.f32 %v2121_v50, 0.0  ;;  %v3300_v52 = vpop.f32.mrb[76].mxu0  ;;  %2508 = vmatprep.mubr.bf16.mxu1 %v4305_v18  ;;  %v1859_v49 = vadd.f32 %v4259_v58, %v4283_v55 }
 0x59c   :  { %v3301_v37 = vpop.f32.mrb[77].mxu0  ;;  %2509 = vmatmul.mubr.bf16.gmra.mrb[116].mxu1 %v3740_v16 }
 0x59d   :  { %v2185_v8 = vadd.f32 %v2169_v5, %v1833_v57  ;;  %v3302_v38 = vadd.f32 %v3301_v37, %v3300_v52  ;;  %v3303_v10 = vpop.f32.mrb[78].mxu0  ;;  %v2200_v42 = vmax.f32 %v2184_v6, 0.0  ;;  %v1863_v57 = vadd.f32 %v4262_v61, %v4283_v55 }
 0x59e   :  { %v3304_v15 = vpop.f32.mrb[79].mxu0 }
 0x59f   :  { %v2201_v56 = vmax.f32 %v2185_v8, 0.0  ;;  %v2126_v3 = vadd.f32 %v3302_v38, %v4279_v54  ;;  %v3305_v24 = vadd.f32 %v3304_v15, %v3303_v10 }
 0x5a1   :  { %v2170_v12 = vmax.f32 %v2126_v3, 0.0  ;;  %v2129_v20 = vadd.f32 %v3305_v24, %v4279_v54  ;;  %v4315_v62 = vpack.c.bf16 %v2201_v56, %v2200_v42  ;;  %v1869_v24 = vadd.f32 %v4265_v7, %v4283_v55 }
 0x5a3   :  { %v2186_v46 = vadd.f32 %v2170_v12, %v1839_v40  ;;  %v2171_v13 = vmax.f32 %v2129_v20, 0.0  ;;  %2518 = vmatprep.mubr.bf16.mxu1 %v4315_v62  ;;  %v1873_v20 = vadd.f32 %v4268_v21, %v4283_v55 }
 0x5a4   :  { %2519 = vmatmul.mubr.bf16.gmra.mrb[120].mxu1 %v3740_v16 }
 0x5a5   :  { %v2187_v19 = vadd.f32 %v2171_v13, %v1843_v26  ;;  %v3306_v27 = vpop.f32.mrb[80].mxu0  ;;  %v2202_v35 = vmax.f32 %v2186_v46, 0.0 }
 0x5a6   :  { %v3307_v51 = vpop.f32.mrb[81].mxu0 }
 0x5a7   :  { %v2203_v1 = vmax.f32 %v2187_v19, 0.0  ;;  %v3308_v4 = vadd.f32 %v3307_v51, %v3306_v27  ;;  %v3309_v33 = vpop.f32.mrb[82].mxu0 }
 0x5a8   :  { %v3310_v36 = vpop.f32.mrb[83].mxu0 }
 0x5a9   :  { %v2134_v41 = vadd.f32 %v3308_v4, %v4279_v54  ;;  %v3311_v22 = vadd.f32 %v3310_v36, %v3309_v33  ;;  %v4322_v2 = vpack.c.bf16 %v2203_v1, %v2202_v35  ;;  %v1879_v36 = vadd.f32 %v4271_v17, %v4283_v55  ;;  %v3658_v17 = vld [vmem:[#allocation5 + $0x1f8] sm:$0xff]  }
 0x5aa   :  { %3344 = vmatprep.subr.bf16.mxu0 %v3658_v17 }
 0x5ab   :  { %v2172_v39 = vmax.f32 %v2134_v41, 0.0  ;;  %v2137_v29 = vadd.f32 %v3311_v22, %v4279_v54  ;;  %2528 = vmatprep.mubr.bf16.mxu1 %v4322_v2 }
 0x5ac   :  { %2529 = vmatmul.mubr.bf16.gmra.mrb[124].mxu1 %v3740_v16 }
 0x5ad   :  { %v2188_v14 = vadd.f32 %v2172_v39, %v1849_v32  ;;  %v2173_v43 = vmax.f32 %v2137_v29, 0.0  ;;  %v3312_v59 = vpop.f32.mrb[84].mxu0  ;;  %v1883_v32 = vadd.f32 %v4274_v30, %v4283_v55  ;;  %v4356_v30 = vld [vmem:[%s4490_s4 + $0xc] ss:$2 sm:$0x3] }
 0x5ae   :  { %v3313_v0 = vpop.f32.mrb[85].mxu0 }
 0x5af   :  { %v2189_v44 = vadd.f32 %v2173_v43, %v1853_v28  ;;  %v3314_v53 = vadd.f32 %v3313_v0, %v3312_v59  ;;  %v3315_v60 = vpop.f32.mrb[86].mxu0  ;;  %v2204_v48 = vmax.f32 %v2188_v14, 0.0  ;;  %v3659_v59 = vld [vmem:[#allocation5 + $0x1b8] sm:$0xff]  }
 0x5b0   :  { %v3316_v47 = vpop.f32.mrb[87].mxu0  ;;  %3345 = vmatpush3.bf16.msra.mxu0 %v3659_v59 }
 0x5b1   :  { %v2205_v25 = vmax.f32 %v2189_v44, 0.0  ;;  %v2142_v63 = vadd.f32 %v3314_v53, %v4279_v54  ;;  %v3317_v34 = vadd.f32 %v3316_v47, %v3315_v60 }
 0x5b3   :  { %v2174_v31 = vmax.f32 %v2142_v63, 0.0  ;;  %v2145_v50 = vadd.f32 %v3317_v34, %v4279_v54  ;;  %v2253_v45 = vpack.c.bf16 %v2205_v25, %v2204_v48 }
 0x5b5   :  { %v2190_v6 = vadd.f32 %v2174_v31, %v1859_v49  ;;  %v2175_v5 = vmax.f32 %v2145_v50, 0.0  ;;  %v3318_v52 = vpop.f32.mrb[88].mxu0  ;;  %2538 = vmatprep.mubr.bf16.mxu1 %v2253_v45 }
 0x5b6   :  { %v3319_v37 = vpop.f32.mrb[89].mxu0  ;;  %2539 = vmatmul.mubr.bf16.gmra.mrb[128].mxu1 %v4295_v23 }
 0x5b7   :  { %v2191_v8 = vadd.f32 %v2175_v5, %v1863_v57  ;;  %v3320_v38 = vadd.f32 %v3319_v37, %v3318_v52  ;;  %v3321_v10 = vpop.f32.mrb[90].mxu0  ;;  %v2206_v42 = vmax.f32 %v2190_v6, 0.0 }
 0x5b8   :  { %v3322_v15 = vpop.f32.mrb[91].mxu0 }
 0x5b9   :  { %v2207_v58 = vmax.f32 %v2191_v8, 0.0  ;;  %v2150_v56 = vadd.f32 %v3320_v38, %v4279_v54  ;;  %v3323_v3 = vadd.f32 %v3322_v15, %v3321_v10 }
 0x5bb   :  { %v2176_v61 = vmax.f32 %v2150_v56, 0.0  ;;  %v2153_v40 = vadd.f32 %v3323_v3, %v4279_v54  ;;  %v2255_v12 = vpack.c.bf16 %v2207_v58, %v2206_v42 }
 0x5bd   :  { %v2192_v23 = vadd.f32 %v2176_v61, %v1869_v24  ;;  %v2177_v26 = vmax.f32 %v2153_v40, 0.0  ;;  %v3324_v46 = vpop.f32.mrb[92].mxu0  ;;  %2548 = vmatprep.mubr.bf16.mxu1 %v2255_v12 }
 0x5be   :  { %v3325_v13 = vpop.f32.mrb[93].mxu0  ;;  %2549 = vmatmul.mubr.bf16.gmra.mrb[132].mxu1 %v4305_v18 }
 0x5bf   :  { %v2193_v19 = vadd.f32 %v2177_v26, %v1873_v20  ;;  %v3326_v27 = vadd.f32 %v3325_v13, %v3324_v46  ;;  %v3327_v51 = vpop.f32.mrb[94].mxu0  ;;  %v2208_v1 = vmax.f32 %v2192_v23, 0.0 }
 0x5c0   :  { %v3328_v35 = vpop.f32.mrb[95].mxu0 }
 0x5c1   :  { %v2209_v7 = vmax.f32 %v2193_v19, 0.0  ;;  %v2158_v4 = vadd.f32 %v3326_v27, %v4279_v54  ;;  %v3329_v33 = vadd.f32 %v3328_v35, %v3327_v51 }
 0x5c3   :  { %v2178_v21 = vmax.f32 %v2158_v4, 0.0  ;;  %v2161_v41 = vadd.f32 %v3329_v33, %v4279_v54  ;;  %v2257_v22 = vpack.c.bf16 %v2209_v7, %v2208_v1  ;;  %v4360_v54 = vrot.slane %v4356_v30, %v3960_v9 }
 0x5c5   :  { %v2194_v18 = vadd.f32 %v2178_v21, %v1879_v36  ;;  %v2179_v39 = vmax.f32 %v2161_v41, 0.0  ;;  %2558 = vmatprep.mubr.bf16.mxu1 %v2257_v22 }
 0x5c6   :  { %2559 = vmatmul.mubr.bf16.gmra.mrb[136].mxu1 %v4315_v62 }
 0x5c7   :  { %v2195_v29 = vadd.f32 %v2179_v39, %v1883_v32  ;;  %v2210_v28 = vmax.f32 %v2194_v18, 0.0 }
 0x5c9   :  { %v2211_v14 = vmax.f32 %v2195_v29, 0.0 }
 0x5cb   :  { %v2259_v43 = vpack.c.bf16 %v2211_v14, %v2210_v28 }
 0x5cd   :  { %2568 = vmatprep.mubr.bf16.mxu1 %v2259_v43 }
 0x5ce   :  { %2569 = vmatmul.mubr.bf16.gmra.mrb[140].mxu1 %v4322_v2 }
 0x667   :  { %v2500_v55 = vpop.f32.mrb[112].mxu1 }
 0x668   :  { %v2501_v62 = vadd.f32 %v2500_v55, %v4360_v54  ;;  %v4363_v0 = vpop.f32.mrb[113].mxu1 }
 0x669   :  { %v2504_v44 = vpop.f32.mrb[114].mxu1 }
 0x66a   :  { %v2579_v2 = vmax.f32 %v2501_v62, 0.0  ;;  %v2505_v53 = vadd.f32 %v2504_v44, %v4360_v54  ;;  %v4366_v60 = vpop.f32.mrb[115].mxu1 }
 0x66c   :  { %v2580_v47 = vmax.f32 %v2505_v53, 0.0 }
 0x66e   :  { %v2612_v48 = vpack.c.bf16 %v2580_v47, %v2579_v2 }
 0x66f   :  { %v2510_v25 = vpop.f32.mrb[116].mxu1 }
 0x670   :  { %v2511_v63 = vadd.f32 %v2510_v25, %v4360_v54  ;;  %v4369_v34 = vpop.f32.mrb[117].mxu1  ;;  %2793 = vmatprep.mubr.bf16.mxu0 %v2612_v48 }
 0x671   :  { %v2514_v9 = vpop.f32.mrb[118].mxu1  ;;  %2794 = vmatmul.mubr.bf16.vlgmr.msra.gmra.mrb[96].mxu0 %v3740_v16 }
 0x672   :  { %v2581_v49 = vmax.f32 %v2511_v63, 0.0  ;;  %v2515_v31 = vadd.f32 %v2514_v9, %v4360_v54  ;;  %v4373_v50 = vpop.f32.mrb[119].mxu1 }
 0x674   :  { %v2582_v45 = vmax.f32 %v2515_v31, 0.0 }
 0x676   :  { %v2614_v57 = vpack.c.bf16 %v2582_v45, %v2581_v49  ;;  %v4417_v45 = vld [vmem:[%s4490_s4 + $0xd] ss:$0 sm:$0xff]  ;;  %s3741_s4 = smov [#allocation7]  }
 0x677   :  { %v2520_v6 = vpop.f32.mrb[120].mxu1  ;;  %s2927_s7 = sshll.u32 %s3741_s4, 4  ;;  %s2928_s7 = int_to_ptr.vmem [resolvable:$true] %s2927_s7 }
 0x678   :  { %v2521_v5 = vadd.f32 %v2520_v6, %v4360_v54  ;;  %v4376_v52 = vpop.f32.mrb[121].mxu1  ;;  %2801 = vmatprep.mubr.bf16.mxu0 %v2614_v57  ;;  %v4421_v6 = vrot.slane %v4356_v30, %v3965_v11  ;;  %s3704_s8 = scalar_lea.vmem %s2928_s7, 2048  ;;  %p3709_p3 = scmp.lt.s32.totalorder %s2928_s7, %s2928_s7 }
 0x679   :  { %v2524_v37 = vpop.f32.mrb[122].mxu1  ;;  %2802 = vmatmul.mubr.bf16.gmra.mrb[100].mxu0 %v3740_v16  ;;  %p3705_p2 = scmp.ne.s32.totalorder %s2928_s7, %s3704_s8  ;;  %p3710_p4 = scmp.lt.s32.totalorder %s3704_s8, %s3704_s8 }
 0x67a   :  { %v2583_v8 = vmax.f32 %v2521_v5, 0.0  ;;  %v2525_v38 = vadd.f32 %v2524_v37, %v4360_v54  ;;  %v4380_v10 = vpop.f32.mrb[123].mxu1 }
 0x67b   :  { %p3711_p5 = por %p3710_p4, %p3709_p3 }
 0x67c   :  { %v2584_v15 = vmax.f32 %v2525_v38, 0.0 }
 0x67d   :  { %p3712_p6 = pnand %p3711_p5, %p3705_p2 }
 0x67e   :  { %v2616_v42 = vpack.c.bf16 %v2584_v15, %v2583_v8  ;;  %v2503_v15 = vadd.f32 %v4363_v0, %v4421_v6 }
 0x67f   :  { %v2530_v58 = vpop.f32.mrb[124].mxu1 }
 0x680   :  { %v2531_v56 = vadd.f32 %v2530_v58, %v4360_v54  ;;  %v4383_v3 = vpop.f32.mrb[125].mxu1  ;;  %2809 = vmatprep.mubr.bf16.mxu0 %v2616_v42 }
 0x681   :  { %v2534_v24 = vpop.f32.mrb[126].mxu1  ;;  %2810 = vmatmul.mubr.bf16.gmra.mrb[104].mxu0 %v3740_v16 }
 0x682   :  { %v2585_v61 = vmax.f32 %v2531_v56, 0.0  ;;  %v2535_v40 = vadd.f32 %v2534_v24, %v4360_v54  ;;  %v4387_v12 = vpop.f32.mrb[127].mxu1  ;;  %v2507_v56 = vadd.f32 %v4366_v60, %v4421_v6 }
 0x684   :  { %v2586_v20 = vmax.f32 %v2535_v40, 0.0 }
 0x686   :  { %v2618_v23 = vpack.c.bf16 %v2586_v20, %v2585_v61 }
 0x688   :  { %2817 = vmatprep.mubr.bf16.mxu0 %v2618_v23 }
 0x689   :  { %v2540_v26 = vpop.f32.mrb[128].mxu1  ;;  %2818 = vmatmul.mubr.bf16.gmra.mrb[108].mxu0 %v3740_v16 }
 0x68a   :  { %v2541_v46 = vadd.f32 %v2540_v26, %v4360_v54  ;;  %v4391_v13 = vpop.f32.mrb[129].mxu1 }
 0x68b   :  { %v2544_v19 = vpop.f32.mrb[130].mxu1 }
 0x68c   :  { %v2545_v27 = vadd.f32 %v2544_v19, %v4360_v54  ;;  %v4394_v51 = vpop.f32.mrb[131].mxu1  ;;  %v2587_v35 = vmax.f32 %v2541_v46, 0.0 }
 0x68e   :  { %v2588_v1 = vmax.f32 %v2545_v27, 0.0 }
 0x690   :  { %v2620_v7 = vpack.c.bf16 %v2588_v1, %v2587_v35  ;;  %v2513_v35 = vadd.f32 %v4369_v34, %v4421_v6 }
 0x691   :  { %v2550_v4 = vpop.f32.mrb[132].mxu1 }
 0x692   :  { %v2551_v33 = vadd.f32 %v2550_v4, %v4360_v54  ;;  %v4397_v36 = vpop.f32.mrb[133].mxu1  ;;  %2825 = vmatprep.mubr.bf16.mxu0 %v2620_v7  ;;  %v2517_v7 = vadd.f32 %v4373_v50, %v4421_v6 }
 0x693   :  { %v2554_v21 = vpop.f32.mrb[134].mxu1  ;;  %2826 = vmatmul.mubr.bf16.gmra.mrb[112].mxu0 %v2612_v48 }
 0x694   :  { %v2555_v16 = vadd.f32 %v2554_v21, %v4360_v54  ;;  %v4400_v41 = vpop.f32.mrb[135].mxu1  ;;  %v2589_v22 = vmax.f32 %v2551_v33, 0.0 }
 0x696   :  { %v2590_v32 = vmax.f32 %v2555_v16, 0.0 }
 0x698   :  { %v2622_v18 = vpack.c.bf16 %v2590_v32, %v2589_v22 }
 0x699   :  { %v2560_v39 = vpop.f32.mrb[136].mxu1 }
 0x69a   :  { %v2561_v29 = vadd.f32 %v2560_v39, %v4360_v54  ;;  %v4403_v28 = vpop.f32.mrb[137].mxu1  ;;  %2833 = vmatprep.mubr.bf16.mxu0 %v2622_v18 }
 0x69b   :  { %v2564_v14 = vpop.f32.mrb[138].mxu1  ;;  %2834 = vmatmul.mubr.bf16.gmra.mrb[116].mxu0 %v2614_v57 }
 0x69c   :  { %v2565_v43 = vadd.f32 %v2564_v14, %v4360_v54  ;;  %v4406_v17 = vpop.f32.mrb[139].mxu1  ;;  %v2591_v59 = vmax.f32 %v2561_v29, 0.0 }
 0x69e   :  { %v2592_v55 = vmax.f32 %v2565_v43, 0.0 }
 0x6a0   :  { %v2624_v62 = vpack.c.bf16 %v2592_v55, %v2591_v59  ;;  %v2523_v59 = vadd.f32 %v4376_v52, %v4421_v6 }
 0x6a1   :  { %v2570_v44 = vpop.f32.mrb[140].mxu1 }
 0x6a2   :  { %v2571_v2 = vadd.f32 %v2570_v44, %v4360_v54  ;;  %v4409_v53 = vpop.f32.mrb[141].mxu1  ;;  %2841 = vmatprep.mubr.bf16.mxu0 %v2624_v62  ;;  %v2527_v62 = vadd.f32 %v4380_v10, %v4421_v6 }
 0x6a3   :  { %v2574_v47 = vpop.f32.mrb[142].mxu1  ;;  %2842 = vmatmul.mubr.bf16.gmra.mrb[120].mxu0 %v2616_v42 }
 0x6a4   :  { %v2575_v48 = vadd.f32 %v2574_v47, %v4360_v54  ;;  %v4412_v25 = vpop.f32.mrb[143].mxu1  ;;  %v2593_v63 = vmax.f32 %v2571_v2, 0.0 }
 0x6a6   :  { %v2594_v9 = vmax.f32 %v2575_v48, 0.0 }
 0x6a8   :  { %v2626_v49 = vpack.c.bf16 %v2594_v9, %v2593_v63 }
 0x6aa   :  { %2849 = vmatprep.mubr.bf16.mxu0 %v2626_v49 }
 0x6ab   :  { %2850 = vmatmul.mubr.bf16.gmra.mrb[124].mxu0 %v2618_v23 }
 0x744   :  { %v3346_v31 = vpop.f32.mrb[96].mxu0 }
 0x745   :  { %v3347_v57 = vpop.f32.mrb[97].mxu0 }
 0x746   :  { %v3348_v5 = vadd.f32 %v3347_v57, %v3346_v31  ;;  %v3349_v54 = vpop.f32.mrb[98].mxu0 }
 0x747   :  { %v3350_v37 = vpop.f32.mrb[99].mxu0 }
 0x748   :  { %v2796_v8 = vadd.f32 %v3348_v5, %v4417_v45  ;;  %v3351_v38 = vadd.f32 %v3350_v37, %v3349_v54  ;;  %v2533_v37 = vadd.f32 %v4383_v3, %v4421_v6 }
 0x74a   :  { %v2858_v42 = vmax.f32 %v2796_v8, 0.0  ;;  %v2799_v58 = vadd.f32 %v3351_v38, %v4417_v45  ;;  %v2537_v38 = vadd.f32 %v4387_v12, %v4421_v6 }
 0x74c   :  { %v2874_v24 = vadd.f32 %v2858_v42, %v2503_v15  ;;  %v2859_v61 = vmax.f32 %v2799_v58, 0.0  ;;  %v3352_v40 = vpop.f32.mrb[100].mxu0 }
 0x74d   :  { %v3353_v11 = vpop.f32.mrb[101].mxu0 }
 0x74e   :  { %v2890_v30 = vmax.f32 %v2874_v24, 0.0  ;;  %v2875_v20 = vadd.f32 %v2859_v61, %v2507_v56  ;;  %v3354_v23 = vadd.f32 %v3353_v11, %v3352_v40  ;;  %v3355_v26 = vpop.f32.mrb[102].mxu0 }
 0x74f   :  { %v3356_v46 = vpop.f32.mrb[103].mxu0 }
 0x750   :  { %2906 = vst [vmem:[#allocation7] sm:$0xff] %v2890_v30  ;;  %v2891_v19 = vmax.f32 %v2875_v20, 0.0  ;;  %v2804_v27 = vadd.f32 %v3354_v23, %v4417_v45  ;;  %v3357_v0 = vadd.f32 %v3356_v46, %v3355_v26  ;;  %v2543_v26 = vadd.f32 %v4391_v13, %v4421_v6 }
 0x752   :  { %2907 = vst [vmem:[#allocation7 + $0x8] sm:$0xff] %v2891_v19  ;;  %v2860_v1 = vmax.f32 %v2804_v27, 0.0  ;;  %v2807_v60 = vadd.f32 %v3357_v0, %v4417_v45  ;;  %v2547_v19 = vadd.f32 %v4394_v51, %v4421_v6 }
 0x754   :  { %v2876_v4 = vadd.f32 %v2860_v1, %v2513_v35  ;;  %v2861_v33 = vmax.f32 %v2807_v60, 0.0  ;;  %v3358_v21 = vpop.f32.mrb[104].mxu0 }
 0x755   :  { %v3359_v16 = vpop.f32.mrb[105].mxu0 }
 0x756   :  { %v2892_v22 = vmax.f32 %v2876_v4, 0.0  ;;  %v2877_v32 = vadd.f32 %v2861_v33, %v2517_v7  ;;  %v3360_v18 = vadd.f32 %v3359_v16, %v3358_v21  ;;  %v3361_v39 = vpop.f32.mrb[106].mxu0 }
 0x757   :  { %v3362_v29 = vpop.f32.mrb[107].mxu0 }
 0x758   :  { %2908 = vst [vmem:[#allocation7 + $0x10] sm:$0xff] %v2892_v22  ;;  %v2893_v14 = vmax.f32 %v2877_v32, 0.0  ;;  %v2812_v34 = vadd.f32 %v3360_v18, %v4417_v45  ;;  %v3363_v43 = vadd.f32 %v3362_v29, %v3361_v39  ;;  %v2553_v32 = vadd.f32 %v4397_v36, %v4421_v6 }
 0x759   :  { %v2557_v39 = vadd.f32 %v4400_v41, %v4421_v6 }
 0x75a   :  { %2909 = vst [vmem:[#allocation7 + $0x18] sm:$0xff] %v2893_v14  ;;  %v2862_v55 = vmax.f32 %v2812_v34, 0.0  ;;  %v2815_v50 = vadd.f32 %v3363_v43, %v4417_v45 }
 0x75c   :  { %v2878_v44 = vadd.f32 %v2862_v55, %v2523_v59  ;;  %v2863_v2 = vmax.f32 %v2815_v50, 0.0  ;;  %v3364_v47 = vpop.f32.mrb[108].mxu0 }
 0x75d   :  { %v3365_v48 = vpop.f32.mrb[109].mxu0 }
 0x75e   :  { %v2894_v63 = vmax.f32 %v2878_v44, 0.0  ;;  %v2879_v9 = vadd.f32 %v2863_v2, %v2527_v62  ;;  %v3366_v49 = vadd.f32 %v3365_v48, %v3364_v47  ;;  %v3367_v31 = vpop.f32.mrb[110].mxu0  ;;  %v2563_v48 = vadd.f32 %v4403_v28, %v4421_v6 }
 0x75f   :  { %v3368_v57 = vpop.f32.mrb[111].mxu0 }
 0x760   :  { %2910 = vst [vmem:[#allocation7 + $0x20] sm:$0xff] %v2894_v63  ;;  %v2895_v5 = vmax.f32 %v2879_v9, 0.0  ;;  %v2820_v52 = vadd.f32 %v3366_v49, %v4417_v45  ;;  %v3369_v54 = vadd.f32 %v3368_v57, %v3367_v31  ;;  %v2567_v9 = vadd.f32 %v4406_v17, %v4421_v6 }
 0x762   :  { %2911 = vst [vmem:[#allocation7 + $0x28] sm:$0xff] %v2895_v5  ;;  %v2864_v8 = vmax.f32 %v2820_v52, 0.0  ;;  %v2823_v10 = vadd.f32 %v3369_v54, %v4417_v45 }
 0x764   :  { %v2880_v15 = vadd.f32 %v2864_v8, %v2533_v37  ;;  %v2865_v42 = vmax.f32 %v2823_v10, 0.0 }
 0x766   :  { %v2896_v58 = vmax.f32 %v2880_v15, 0.0  ;;  %v2881_v56 = vadd.f32 %v2865_v42, %v2537_v38  ;;  %v3370_v24 = vpop.f32.mrb[112].mxu0  ;;  %v2573_v42 = vadd.f32 %v4409_v53, %v4421_v6 }
 0x767   :  { %v3371_v61 = vpop.f32.mrb[113].mxu0 }
 0x768   :  { %2912 = vst [vmem:[#allocation7 + $0x30] sm:$0xff] %v2896_v58  ;;  %v2897_v40 = vmax.f32 %v2881_v56, 0.0  ;;  %v3372_v11 = vadd.f32 %v3371_v61, %v3370_v24  ;;  %v3373_v30 = vpop.f32.mrb[114].mxu0  ;;  %v2577_v56 = vadd.f32 %v4412_v25, %v4421_v6 }
 0x769   :  { %v3374_v20 = vpop.f32.mrb[115].mxu0 }
 0x76a   :  { %2913 = vst [vmem:[#allocation7 + $0x38] sm:$0xff] %v2897_v40  ;;  %v2828_v3 = vadd.f32 %v3372_v11, %v4417_v45  ;;  %v3375_v23 = vadd.f32 %v3374_v20, %v3373_v30 }
 0x76c   :  { %v2866_v46 = vmax.f32 %v2828_v3, 0.0  ;;  %v2831_v12 = vadd.f32 %v3375_v23, %v4417_v45 }
 0x76e   :  { %v2882_v27 = vadd.f32 %v2866_v46, %v2543_v26  ;;  %v2867_v0 = vmax.f32 %v2831_v12, 0.0  ;;  %v3376_v35 = vpop.f32.mrb[116].mxu0 }
 0x76f   :  { %v3377_v1 = vpop.f32.mrb[117].mxu0 }
 0x770   :  { %v2898_v60 = vmax.f32 %v2882_v27, 0.0  ;;  %v2883_v7 = vadd.f32 %v2867_v0, %v2547_v19  ;;  %v3378_v4 = vadd.f32 %v3377_v1, %v3376_v35  ;;  %v3379_v33 = vpop.f32.mrb[118].mxu0 }
 0x771   :  { %v3380_v21 = vpop.f32.mrb[119].mxu0 }
 0x772   :  { %2914 = vst [vmem:[#allocation7 + $0x40] sm:$0xff] %v2898_v60  ;;  %v2899_v16 = vmax.f32 %v2883_v7, 0.0  ;;  %v2836_v22 = vadd.f32 %v3378_v4, %v4417_v45  ;;  %v3381_v13 = vadd.f32 %v3380_v21, %v3379_v33 }
 0x774   :  { %2915 = vst [vmem:[#allocation7 + $0x48] sm:$0xff] %v2899_v16  ;;  %v2868_v18 = vmax.f32 %v2836_v22, 0.0  ;;  %v2839_v51 = vadd.f32 %v3381_v13, %v4417_v45 }
 0x776   :  { %v2884_v29 = vadd.f32 %v2868_v18, %v2553_v32  ;;  %v2869_v14 = vmax.f32 %v2839_v51, 0.0  ;;  %v3382_v34 = vpop.f32.mrb[120].mxu0 }
 0x777   :  { %v3383_v43 = vpop.f32.mrb[121].mxu0 }
 0x778   :  { %v2900_v59 = vmax.f32 %v2884_v29, 0.0  ;;  %v2885_v55 = vadd.f32 %v2869_v14, %v2557_v39  ;;  %v3384_v50 = vadd.f32 %v3383_v43, %v3382_v34  ;;  %v3385_v62 = vpop.f32.mrb[122].mxu0 }
 0x779   :  { %v3386_v44 = vpop.f32.mrb[123].mxu0 }
 0x77a   :  { %2916 = vst [vmem:[#allocation7 + $0x50] sm:$0xff] %v2900_v59  ;;  %v2901_v2 = vmax.f32 %v2885_v55, 0.0  ;;  %v2844_v36 = vadd.f32 %v3384_v50, %v4417_v45  ;;  %v3387_v47 = vadd.f32 %v3386_v44, %v3385_v62 }
 0x77c   :  { %2917 = vst [vmem:[#allocation7 + $0x58] sm:$0xff] %v2901_v2  ;;  %v2870_v63 = vmax.f32 %v2844_v36, 0.0  ;;  %v2847_v41 = vadd.f32 %v3387_v47, %v4417_v45 }
 0x77e   :  { %v2886_v49 = vadd.f32 %v2870_v63, %v2563_v48  ;;  %v2871_v31 = vmax.f32 %v2847_v41, 0.0  ;;  %v3388_v57 = vpop.f32.mrb[124].mxu0 }
 0x77f   :  { %v3389_v5 = vpop.f32.mrb[125].mxu0 }
 0x780   :  { %v2902_v52 = vmax.f32 %v2886_v49, 0.0  ;;  %v2887_v54 = vadd.f32 %v2871_v31, %v2567_v9  ;;  %v3390_v37 = vadd.f32 %v3389_v5, %v3388_v57  ;;  %v3391_v8 = vpop.f32.mrb[126].mxu0 }
 0x781   :  { %v3392_v10 = vpop.f32.mrb[127].mxu0 }
 0x782   :  { %2918 = vst [vmem:[#allocation7 + $0x60] sm:$0xff] %v2902_v52  ;;  %v2903_v38 = vmax.f32 %v2887_v54, 0.0  ;;  %v2852_v28 = vadd.f32 %v3390_v37, %v4417_v45  ;;  %v3393_v15 = vadd.f32 %v3392_v10, %v3391_v8 }
 0x784   :  { %2919 = vst [vmem:[#allocation7 + $0x68] sm:$0xff] %v2903_v38  ;;  %v2872_v58 = vmax.f32 %v2852_v28, 0.0  ;;  %v2855_v17 = vadd.f32 %v3393_v15, %v4417_v45 }
 0x786   :  { %v2888_v24 = vadd.f32 %v2872_v58, %v2573_v42  ;;  %v2873_v61 = vmax.f32 %v2855_v17, 0.0 }
 0x788   :  { %v2904_v40 = vmax.f32 %v2888_v24, 0.0  ;;  %v2889_v11 = vadd.f32 %v2873_v61, %v2577_v56 }
 0x78a   :  { %2920 = vst [vmem:[#allocation7 + $0x70] sm:$0xff] %v2904_v40  ;;  %v2905_v30 = vmax.f32 %v2889_v11, 0.0 }
 0x78c   :  { %2921 = vst [vmem:[#allocation7 + $0x78] sm:$0xff] %v2905_v30 }
 0x78d   :  { %3715 = shalt.err (!%p3712_p6)
}
 0x78e   :  { %s3716_s11 = scalar_lea.hbm %s4491_s5, 2048 }
 0x78f   :  { %p3717_p7 = scmp.ne.s32.totalorder %s4491_s5, %s3716_s11  ;;  %p3720_p8 = scmp.lt.u32.totalorder %s3716_s11, %s4491_s5 }
 0x791   :  { %p3722_p9 = pnand %p3720_p8, %p3717_p7 }
 0x793   :  { %3725 = shalt.err (!%p3722_p9)
}
 0x794   :  { %2933 = dma.vmem_to_hbm [thread:$0]  %s2928_s7, 2048, %s4491_s5, [#allocation4], %s3733_s28, %s3733_s28, %s3734_s29  }
 0x795   :  { %3730 = dma.done.wait [#allocation4], 2048  }
 0x796   :  { %3731 = vsyncadd [#allocation4], 4294965248 }
 0x797   :  { %2937 = vsyncpa [#allocation3], 1 }
 0x798   :  { %2938 = vsyncpa [#allocation6], 1 }
 0x799   :  { %2939 = vsyncpa [#allocation4], 1 }

</bundles_post_ra>
